<compile_context>
chip_gen: v7x
topology: tpu7x:2x2x1
jax: 0.10.0
libtpu: 0.0.40
codegen_flags: <defaults>
</compile_context>

<pallas_src>
import functools

import jax
import jax.numpy as jnp
from jax.experimental import pallas as pl
from jax.experimental.pallas import tpu as pltpu


# ----------------------------------------------------------------------------
# Pallas kernel: correspondence tile.
# One grid step = (bt batches) x (tq query rows) against all N database points.
# ----------------------------------------------------------------------------
def _corr_kernel(f0_ref, f1_ref, smap_ref, idx_ref, *, inv_T, n_cols):
    f0 = f0_ref[...]            # [bt, tq, Dp] fp32
    f1 = f1_ref[...]            # [bt, N,  Dp] fp32

    # L2 normalization with torch eps placement: x / (||x|| + 1e-6).
    # Per-row reciprocals are O(rows); the big tensors only ever see multiplies.
    inv0 = pl.reciprocal(jnp.sqrt(jnp.sum(f0 * f0, axis=-1, keepdims=True)) + 1e-6)
    inv1 = pl.reciprocal(jnp.sqrt(jnp.sum(f1 * f1, axis=-1, keepdims=True)) + 1e-6)

    # Fold 1/T into the (cheap, O(N*D)) per-element scale of f0, then cast both
    # operands to bf16 for the MXU; accumulate in f32.
    a = (f0 * (inv0 * inv_T)).astype(jnp.bfloat16)   # [bt, tq, Dp]
    b = (f1 * inv1).astype(jnp.bfloat16)             # [bt, N,  Dp]
    s = jnp.einsum("bqd,bkd->bqk", a, b,
                   preferred_element_type=jnp.float32)           # [bt, tq, N] f32

    # Row-wise softmax: exp on the EUP; denominator divide replaced by a
    # per-row approx reciprocal (EUP) and an N^2 multiply.
    m = jnp.max(s, axis=-1, keepdims=True)                        # [bt, tq, 1]
    e = jnp.exp(s - m)
    denom = jnp.sum(e, axis=-1, keepdims=True)
    smap_ref[...] = (e * pl.reciprocal(denom, approx=True)).astype(smap_ref.dtype)

    # argmax over the last dim (first occurrence, matching torch/jnp); softmax
    # is monotone per-row so argmax(s) == argmax(smap).  Kept on the fp32-
    # accumulated scores.
    col = jax.lax.broadcasted_iota(jnp.int32, s.shape, 2)
    idx = jnp.min(jnp.where(s == m, col, n_cols), axis=-1, keepdims=True)
    idx_ref[...] = idx.astype(jnp.int32)


def _choose_tiles(B, N):
    """Pick (bt, tq): tq = multiple-of-8 divisor of N (<=256 for large N);
    pack small batches so every grid step carries a reasonable amount of work."""
    tq = N
    if N > 256:
        for cand in range(256, 7, -8):
            if N % cand == 0:
                tq = cand
                break
    bt = 1
    while bt * 2 <= B and B % (bt * 2) == 0 and bt * tq <= 128:
        bt *= 2
    return bt, tq


def _vmem_limit_bytes(bt, tq, N, Dp):
    per_buf = bt * 4 * (tq * Dp + N * Dp + tq * N + tq)   # fp32 blocks, 1 buffer
    est = 2 * per_buf + 8 * bt * tq * N * 4               # double buffers + temps
    return int(min(56 * 2**20, max(32 * 2**20, est)))


def correspondence_pallas(f0, f1, xyz1, T, *, smap_dtype=jnp.float32):
    """f0, f1: [B, N, D] float32; xyz1: [B, N, 3] float32.
    Returns smap [B,N,N], idxmax [B,N] int32, sxyz1 [B,N,3]."""
    B, N, D = f0.shape
    f0 = f0.astype(jnp.float32)
    f1 = f1.astype(jnp.float32)

    # Zero-pad the feature (lane) dim to a multiple of 128: exact (zeros change
    # neither norms nor dot products) and makes loads / VPU work lane-dense.
    Dp = ((D + 127) // 128) * 128
    if Dp != D:
        pad = ((0, 0), (0, 0), (0, Dp - D))
        f0 = jnp.pad(f0, pad)
        f1 = jnp.pad(f1, pad)

    bt, tq = _choose_tiles(B, N)
    grid = (B // bt, N // tq)
    kernel = functools.partial(_corr_kernel, inv_T=1.0 / float(T), n_cols=N)

    smap, idx = pl.pallas_call(
        kernel,
        out_shape=(
            jax.ShapeDtypeStruct((B, N, N), smap_dtype),
            jax.ShapeDtypeStruct((B, N, 1), jnp.int32),
        ),
        grid=grid,
        in_specs=[
            pl.BlockSpec((bt, tq, Dp), lambda bi, qi: (bi, qi, 0)),   # f0 tile
            pl.BlockSpec((bt, N, Dp), lambda bi, qi: (bi, 0, 0)),     # f1 full
        ],
        out_specs=(
            pl.BlockSpec((bt, tq, N), lambda bi, qi: (bi, qi, 0)),    # lane-dense smap
            pl.BlockSpec((bt, tq, 1), lambda bi, qi: (bi, qi, 0)),    # tiny idx column
        ),
        compiler_params=pltpu.CompilerParams(
            dimension_semantics=("parallel", "parallel"),
            vmem_limit_bytes=_vmem_limit_bytes(bt, tq, N, Dp)),
    )(f0, f1)

    idxmax = idx[..., 0]
    # Gather of matched coordinates moved out of the kernel (O(N*3) work, free
    # in the wrapper; removes an N^2 one-hot matmul + lane-sparse stores).
    sxyz1 = jnp.take_along_axis(xyz1, idxmax[..., None], axis=1)
    return smap, idxmax, sxyz1


# ----------------------------------------------------------------------------
# Plain-JAX glue: deterministic stand-ins for the abstract encoder / graphNet
# ----------------------------------------------------------------------------
def make_params(key, D=32, H=32):
    k1, k2, k3 = jax.random.split(key, 3)
    return {
        "W1": 0.1 * jax.random.normal(k1, (4, H), jnp.float32),
        "b1": jnp.zeros((H,), jnp.float32),
        "W2": 0.1 * jax.random.normal(k2, (H, D), jnp.float32),
        "b2": jnp.zeros((D,), jnp.float32),
        "Wg": 0.1 * jax.random.normal(k3, (D, D), jnp.float32),
    }


def encoder(params, pts):
    """pts [2B, N, 4] -> xyz [2B, N, 3], f [2B, N, D]  (point-wise MLP stand-in)."""
    xyz = pts[..., :3]
    h = jnp.tanh(pts @ params["W1"] + params["b1"])
    f = h @ params["W2"] + params["b2"]
    return xyz, f


def graph_net(params, xyz0, xyz1, f0, f1):
    """Simple residual point-wise mixing stand-in for the GNN."""
    f0a = f0 + jnp.tanh(f0 @ params["Wg"])
    f1a = f1 + jnp.tanh(f1 @ params["Wg"])
    return f0a, f1a


def fastreg_forward(params, pb, T):
    """pb [B, 2, N, 4] -> (R [B,3,3], t [B,1,3], smap, idxmax, sxyz1)."""
    assert pb.ndim == 4 and pb.shape[1] == 2 and pb.shape[3] == 4
    B = pb.shape[0]
    pb2 = pb.reshape(2 * B, pb.shape[2], pb.shape[3])

    xyz, f = encoder(params, pb2)
    xyz0, xyz1 = xyz[0::2], xyz[1::2]
    f0, f1 = f[0::2], f[1::2]
    f0, f1 = graph_net(params, xyz0, xyz1, f0, f1)

    smap, idxmax, sxyz1 = correspondence_pallas(
        f0.astype(jnp.float32), f1.astype(jnp.float32),
        xyz1.astype(jnp.float32), T)

    # TODO(synk): open3d registration_ransac_based_on_correspondence (R, t) has
    # no Pallas/TPU equivalent; identity R and zero t placeholders returned.
    R = jnp.tile(jnp.eye(3, dtype=jnp.float32)[None], (B, 1, 1))
    t = jnp.zeros((B, 1, 3), jnp.float32)
    return R, t, smap, idxmax, sxyz1


# ----------------------------------------------------------------------------
# Pure-jnp reference for validation of the kernelized hot path.
# matmul_dtype=bfloat16 mirrors the kernel's MXU precision (1/T folded into f0
# before the cast, f32 accumulation); float32 is the torch-parity check.
# ----------------------------------------------------------------------------
def correspondence_ref(f0, f1, xyz1, T, matmul_dtype=jnp.float32):
    f0n = f0 / (jnp.linalg.norm(f0, axis=-1, keepdims=True) + 1e-6)
    f1n = f1 / (jnp.linalg.norm(f1, axis=-1, keepdims=True) + 1e-6)
    a = (f0n * (1.0 / T)).astype(matmul_dtype)
    b = f1n.astype(matmul_dtype)
    s = jnp.einsum("bnd,bmd->bnm", a, b, preferred_element_type=jnp.float32)
    smap = jax.nn.softmax(s, axis=-1)
    idxmax = jnp.argmax(s, axis=-1).astype(jnp.int32)
    sxyz1 = jnp.take_along_axis(xyz1, idxmax[..., None], axis=1)
    return smap, idxmax, sxyz1


if __name__ == "__main__":
    key = jax.random.PRNGKey(0)
    kp, kx = jax.random.split(key)

    B, N, D, T = 2, 64, 32, 0.1
    params = make_params(kp, D=D, H=32)
    pb = jax.random.normal(kx, (B, 2, N, 4), jnp.float32)

    R, t, smap, idxmax, sxyz1 = fastreg_forward(params, pb, T)
    jax.block_until_ready((R, t, smap, idxmax, sxyz1))

    # Re-derive the kernel inputs for validation.
    pb2 = pb.reshape(2 * B, N, 4)
    xyz, f = encoder(params, pb2)
    xyz0, xyz1 = xyz[0::2], xyz[1::2]
    f0, f1 = graph_net(params, xyz0, xyz1, f[0::2], f[1::2])

    # (1) Tight check vs. a reference mirroring the kernel's precision
    #     (bf16 matmul operands, f32 accumulation).
    smap_b, idx_b, sxyz1_b = correspondence_ref(f0, f1, xyz1, T, jnp.bfloat16)
    assert jnp.allclose(smap, smap_b, atol=1e-2, rtol=1e-2), "smap mismatch (bf16 ref)"
    assert jnp.array_equal(idxmax, idx_b), "idxmax mismatch (bf16 ref)"
    assert jnp.allclose(sxyz1, sxyz1_b, atol=1e-5), "sxyz1 mismatch (bf16 ref)"

    # (2) Loose torch-parity sanity check vs. the fp32 reference
    #     (tolerances sized for the bf16 score matmul).
    smap_f, idx_f, _ = correspondence_ref(f0, f1, xyz1, T, jnp.float32)
    assert jnp.allclose(smap, smap_f, atol=6e-2, rtol=6e-2), "smap mismatch (fp32 ref)"
    agree = float(jnp.mean((idxmax == idx_f).astype(jnp.float32)))
    assert agree >= 0.95, f"idxmax agreement vs fp32 ref too low: {agree}"

    print("KERNEL_OK")
</pallas_src>

<mosaic_0001>
module attributes {stable_mosaic.version = 11 : i64} {
  func.func @_corr_kernel(%arg0: i32, %arg1: i32, %arg2: memref<2x64x128xf32, #tpu.memory_space<vmem>>, %arg3: memref<2x64x128xf32, #tpu.memory_space<vmem>>, %arg4: memref<2x64x64xf32, #tpu.memory_space<vmem>>, %arg5: memref<2x64x1xi32, #tpu.memory_space<vmem>>) attributes {dimension_semantics = [#tpu.dimension_semantics<parallel>, #tpu.dimension_semantics<parallel>], iteration_bounds = array<i64: 1, 1>, scalar_prefetch = 0 : i64, scratch_operands = 0 : i64, tpu.core_type = #tpu.core_type<tc>, window_params = [{transform_indices = @transform_0, window_bounds = array<i64: 2, 64, 128>}, {transform_indices = @transform_1, window_bounds = array<i64: 2, 64, 128>}, {transform_indices = @transform_2, window_bounds = array<i64: 2, 64, 64>}, {transform_indices = @transform_3, window_bounds = array<i64: 2, 64, 1>}]} {
    %c0 = arith.constant 0 : index
    %c0_0 = arith.constant 0 : index
    %c0_1 = arith.constant 0 : index
    %0 = vector.load %arg2[%c0, %c0_0, %c0_1] : memref<2x64x128xf32, #tpu.memory_space<vmem>>, vector<2x64x128xf32>
    %c0_2 = arith.constant 0 : index
    %c0_3 = arith.constant 0 : index
    %c0_4 = arith.constant 0 : index
    %1 = vector.load %arg3[%c0_2, %c0_3, %c0_4] : memref<2x64x128xf32, #tpu.memory_space<vmem>>, vector<2x64x128xf32>
    %2 = arith.mulf %0, %0 : vector<2x64x128xf32>
    %cst = arith.constant dense<0.000000e+00> : vector<2x64xf32>
    %3 = vector.multi_reduction <add>, %2, %cst [2] : vector<2x64x128xf32> to vector<2x64xf32>
    %4 = vector.shape_cast %3 : vector<2x64xf32> to vector<2x64x1xf32>
    %5 = math.sqrt %4 : vector<2x64x1xf32>
    %cst_5 = arith.constant 9.99999997E-7 : f32
    %6 = vector.broadcast %cst_5 : f32 to vector<2x64x1xf32>
    %7 = arith.addf %5, %6 : vector<2x64x1xf32>
    %8 = tpu.reciprocal %7 : vector<2x64x1xf32> -> vector<2x64x1xf32>
    %9 = arith.mulf %1, %1 : vector<2x64x128xf32>
    %cst_6 = arith.constant dense<0.000000e+00> : vector<2x64xf32>
    %10 = vector.multi_reduction <add>, %9, %cst_6 [2] : vector<2x64x128xf32> to vector<2x64xf32>
    %11 = vector.shape_cast %10 : vector<2x64xf32> to vector<2x64x1xf32>
    %12 = math.sqrt %11 : vector<2x64x1xf32>
    %cst_7 = arith.constant 9.99999997E-7 : f32
    %13 = vector.broadcast %cst_7 : f32 to vector<2x64x1xf32>
    %14 = arith.addf %12, %13 : vector<2x64x1xf32>
    %15 = tpu.reciprocal %14 : vector<2x64x1xf32> -> vector<2x64x1xf32>
    %cst_8 = arith.constant 1.000000e+01 : f32
    %16 = vector.broadcast %cst_8 : f32 to vector<2x64x1xf32>
    %17 = arith.mulf %8, %16 : vector<2x64x1xf32>
    %18 = vector.broadcast %17 : vector<2x64x1xf32> to vector<2x64x128xf32>
    %19 = arith.mulf %0, %18 : vector<2x64x128xf32>
    %20 = arith.truncf %19 : vector<2x64x128xf32> to vector<2x64x128xbf16>
    %21 = vector.broadcast %15 : vector<2x64x1xf32> to vector<2x64x128xf32>
    %22 = arith.mulf %1, %21 : vector<2x64x128xf32>
    %23 = arith.truncf %22 : vector<2x64x128xf32> to vector<2x64x128xbf16>
    "tpu.trace_start"() <{level = 10 : i32, message = "bqd,bkd->bqk"}> : () -> ()
    %cst_9 = arith.constant dense<0.000000e+00> : vector<2x64x64xf32>
    %24 = tpu.matmul %20, %23, %cst_9 {dimension_numbers = #tpu.dot_dimension_numbers<[2], [2], [1], [1], [0, 0, 0, 1, 1, 1], [0], [0]>} : vector<2x64x128xbf16>, vector<2x64x128xbf16>, vector<2x64x64xf32> -> vector<2x64x64xf32>
    "tpu.trace_stop"() : () -> ()
    %cst_10 = arith.constant dense<0xFF800000> : vector<2x64xf32>
    %25 = vector.multi_reduction <maximumf>, %24, %cst_10 [2] : vector<2x64x64xf32> to vector<2x64xf32>
    %26 = vector.shape_cast %25 : vector<2x64xf32> to vector<2x64x1xf32>
    %27 = vector.broadcast %26 : vector<2x64x1xf32> to vector<2x64x64xf32>
    %28 = arith.subf %24, %27 : vector<2x64x64xf32>
    %29 = math.exp %28 : vector<2x64x64xf32>
    %cst_11 = arith.constant dense<0.000000e+00> : vector<2x64xf32>
    %30 = vector.multi_reduction <add>, %29, %cst_11 [2] : vector<2x64x64xf32> to vector<2x64xf32>
    %31 = vector.shape_cast %30 : vector<2x64xf32> to vector<2x64x1xf32>
    %32 = tpu.reciprocal %31 {approx = true} : vector<2x64x1xf32> -> vector<2x64x1xf32>
    %33 = vector.broadcast %32 : vector<2x64x1xf32> to vector<2x64x64xf32>
    %34 = arith.mulf %29, %33 : vector<2x64x64xf32>
    %c0_12 = arith.constant 0 : index
    %c0_13 = arith.constant 0 : index
    %c0_14 = arith.constant 0 : index
    %35 = vector.load %arg4[%c0_12, %c0_13, %c0_14] : memref<2x64x64xf32, #tpu.memory_space<vmem>>, vector<2x64x64xf32>
    tpu.vector_store %arg4[%c0_12, %c0_13, %c0_14], %34 {strides = array<i32>} : memref<2x64x64xf32, #tpu.memory_space<vmem>>, vector<2x64x64xf32>,
    %36 = tpu.iota {dimensions = array<i32: 2>} : vector<2x64x64xi32>
    %37 = vector.broadcast %26 : vector<2x64x1xf32> to vector<2x64x64xf32>
    %38 = arith.cmpf oeq, %24, %37 : vector<2x64x64xf32>
    %c64_i32 = arith.constant 64 : i32
    %39 = vector.broadcast %c64_i32 : i32 to vector<2x64x64xi32>
    %40 = arith.select %38, %36, %39 : vector<2x64x64xi1>, vector<2x64x64xi32>
    %cst_15 = arith.constant dense<2147483647> : vector<2x64xi32>
    %41 = vector.multi_reduction <minsi>, %40, %cst_15 [2] : vector<2x64x64xi32> to vector<2x64xi32>
    %42 = vector.shape_cast %41 : vector<2x64xi32> to vector<2x64x1xi32>
    %c0_16 = arith.constant 0 : index
    %c0_17 = arith.constant 0 : index
    %c0_18 = arith.constant 0 : index
    %43 = vector.load %arg5[%c0_16, %c0_17, %c0_18] : memref<2x64x1xi32, #tpu.memory_space<vmem>>, vector<2x64x1xi32>
    tpu.vector_store %arg5[%c0_16, %c0_17, %c0_18], %42 {strides = array<i32>} : memref<2x64x1xi32, #tpu.memory_space<vmem>>, vector<2x64x1xi32>,
    return
  }
  func.func @transform_0(%arg0: i32, %arg1: i32) -> (i32, i32, i32) {
    %c0_i32 = arith.constant 0 : i32
    %c0_i32_0 = arith.constant 0 : i32
    return %arg0, %arg1, %c0_i32 : i32, i32, i32
  }
  func.func @transform_1(%arg0: i32, %arg1: i32) -> (i32, i32, i32) {
    %c0_i32 = arith.constant 0 : i32
    %c0_i32_0 = arith.constant 0 : i32
    %c0_i32_1 = arith.constant 0 : i32
    return %arg0, %c0_i32, %c0_i32_0 : i32, i32, i32
  }
  func.func @transform_2(%arg0: i32, %arg1: i32) -> (i32, i32, i32) {
    %c0_i32 = arith.constant 0 : i32
    %c0_i32_0 = arith.constant 0 : i32
    return %arg0, %arg1, %c0_i32 : i32, i32, i32
  }
  func.func @transform_3(%arg0: i32, %arg1: i32) -> (i32, i32, i32) {
    %c0_i32 = arith.constant 0 : i32
    %c0_i32_0 = arith.constant 0 : i32
    return %arg0, %arg1, %c0_i32 : i32, i32, i32
  }
}

</mosaic_0001>

<bundles_post_ra>
// kernel: tpu_custom_call.1
= control target key start
LH: loop header
LB: loop body
LE: loop exit
PB: predicated region body
PF: predicated region fallthrough
CT: control target
= control target key end

     0   :  { %9 = vsyncpa [#allocation3], 0  ;;  %s2677_s0 = inlined_call_operand.hbm [shape: f32[2,64,128], index: 0, kind: input, shape index: {}]   ;;  %s2678_s1 = inlined_call_operand.hbm [shape: f32[2,64,128], index: 1, kind: input, shape index: {}]   ;;  %s2679_s2 = inlined_call_operand.hbm [shape: f32[2,64,64], index: 2, kind: output, shape index: {0}]   ;;  %s2680_s3 = inlined_call_operand.vmem [shape: s32[2,64,1], index: 3, kind: output, shape index: {1}]  }
   0x1   :  { %10 = vsyncpa [#allocation6], 0 }
   0x2   :  { %11 = vsyncpa [#allocation4], 0  ;;  %s1476_s12 = smov [#allocation2]   ;;  %s1404_s16 = scalar_lea.hbm %s2677_s0, 2048 }
   0x3   :  { %s17_s13 = sshll.u32 %s1476_s12, 4  ;;  %p1405_p0 = scmp.ne.s32.totalorder %s2677_s0, %s1404_s16  ;;  %s18_s13 = int_to_ptr.vmem [resolvable:$true] %s17_s13 }
   0x4   :  { %p1408_p1 = scmp.lt.u32.totalorder %s1404_s16, %s2677_s0 }
   0x6   :  { %p1410_p2 = pnand %p1408_p1, %p1405_p0 }
   0x8   :  { %1413 = shalt.err (!%p1410_p2)
}
   0x9   :  { %s1414_s21 = scalar_lea.vmem %s18_s13, 2048  ;;  %p1419_p4 = scmp.lt.s32.totalorder %s18_s13, %s18_s13 }
   0xa   :  { %p1415_p3 = scmp.ne.s32.totalorder %s18_s13, %s1414_s21  ;;  %p1420_p5 = scmp.lt.s32.totalorder %s1414_s21, %s1414_s21 }
   0xc   :  { %p1421_p6 = por %p1420_p5, %p1419_p4 }
   0xe   :  { %p1422_p7 = pnand %p1421_p6, %p1415_p3 }
  0x10   :  { %1425 = shalt.err (!%p1422_p7)
}
  0x11   :  { %s1477_s22 = smov 128   ;;  %s1478_s23 = smov 8  }
  0x12   :  { %23 = dma.hbm_to_vmem [thread:$0]  %s2677_s0, 2048, %s18_s13, [#allocation3], %s1477_s22, %s1477_s22, %s1478_s23  }
  0x13   :  { %s1479_s26 = smov [#allocation5]   ;;  %s1426_s30 = scalar_lea.hbm %s2678_s1, 2048 }
  0x14   :  { %s29_s27 = sshll.u32 %s1479_s26, 4  ;;  %p1427_p8 = scmp.ne.s32.totalorder %s2678_s1, %s1426_s30  ;;  %s30_s27 = int_to_ptr.vmem [resolvable:$true] %s29_s27 }
  0x15   :  { %p1430_p9 = scmp.lt.u32.totalorder %s1426_s30, %s2678_s1 }
  0x17   :  { %p1432_p10 = pnand %p1430_p9, %p1427_p8 }
  0x19   :  { %1435 = shalt.err (!%p1432_p10)
}
  0x1a   :  { %s1436_s8 = scalar_lea.vmem %s30_s27, 2048  ;;  %p1441_p12 = scmp.lt.s32.totalorder %s30_s27, %s30_s27 }
  0x1b   :  { %p1437_p11 = scmp.ne.s32.totalorder %s30_s27, %s1436_s8  ;;  %p1442_p13 = scmp.lt.s32.totalorder %s1436_s8, %s1436_s8 }
  0x1d   :  { %p1443_p0 = por %p1442_p13, %p1441_p12 }
  0x1f   :  { %p1444_p1 = pnand %p1443_p0, %p1437_p11 }
  0x21   :  { %1447 = shalt.err (!%p1444_p1)
}
  0x22   :  { %35 = dma.hbm_to_vmem [thread:$0]  %s2678_s1, 2048, %s30_s27, [#allocation6], %s1477_s22, %s1477_s22, %s1478_s23  }
  0x23   :  { %1470 = dma.done.wait [#allocation3], 2048  }
  0x24   :  { %1471 = vsyncadd [#allocation3], 4294965248 }
  0x25   :  { %1472 = dma.done.wait [#allocation6], 2048  }
  0x26   :  { %1473 = vsyncadd [#allocation6], 4294965248  ;;  %v1531_v0 = vld [vmem:[#allocation5 + $0x40] sm:$0xff]  ;;  %v1535_v2 = vld [vmem:[#allocation5 + $0x48] sm:$0xff]  ;;  %s1480_s1 = smov [#allocation7]  }
  0x27   :  { %v1533_v1 = vld [vmem:[#allocation5] sm:$0xff]  ;;  %v275_v3 = vmul.f32 %v1531_v0, %v1531_v0  ;;  %v1541_v5 = vld [vmem:[#allocation5 + $0x8] sm:$0xff]  ;;  %v276_v6 = vmul.f32 %v1535_v2, %v1535_v2  ;;  %v1547_v8 = vld [vmem:[#allocation5 + $0x18] sm:$0xff]  ;;  %s1142_s10 = sshll.u32 %s1480_s1, 4  ;;  %s1143_s10 = int_to_ptr.vmem [resolvable:$true] %s1142_s10 }
  0x28   :  { %v267_v4 = vmul.f32 %v1533_v1, %v1533_v1  ;;  %v268_v7 = vmul.f32 %v1541_v5, %v1541_v5  ;;  %v1549_v9 = vld [vmem:[#allocation5 + $0x10] sm:$0xff]  ;;  %v270_v10 = vmul.f32 %v1547_v8, %v1547_v8  ;;  %v1555_v12 = vld [vmem:[#allocation5 + $0x58] sm:$0xff]  ;;  %v1563_v16 = vld [vmem:[#allocation5 + $0x28] sm:$0xff]  ;;  %s1448_s11 = scalar_lea.vmem %s1143_s10, 2048  ;;  %p1453_p3 = scmp.lt.s32.totalorder %s1143_s10, %s1143_s10 }
  0x29   :  { %299 = vadd.xlane.f32.xlu1 %v275_v3  ;;  %v269_v11 = vmul.f32 %v1549_v9, %v1549_v9  ;;  %v1557_v13 = vld [vmem:[#allocation5 + $0x50] sm:$0xff]  ;;  %v278_v14 = vmul.f32 %v1555_v12, %v1555_v12  ;;  %v1565_v17 = vld [vmem:[#allocation5 + $0x20] sm:$0xff]  ;;  %v272_v18 = vmul.f32 %v1563_v16, %v1563_v16  ;;  %v1571_v20 = vld [vmem:[#allocation5 + $0x68] sm:$0xff]  ;;  %p1449_p2 = scmp.ne.s32.totalorder %s1143_s10, %s1448_s11  ;;  %p1454_p4 = scmp.lt.s32.totalorder %s1448_s11, %s1448_s11 }
  0x2a   :  { %283 = vadd.xlane.f32.xlu0 %v267_v4  ;;  %v277_v15 = vmul.f32 %v1557_v13, %v1557_v13  ;;  %v271_v19 = vmul.f32 %v1565_v17, %v1565_v17  ;;  %v1573_v21 = vld [vmem:[#allocation5 + $0x60] sm:$0xff]  ;;  %v280_v22 = vmul.f32 %v1571_v20, %v1571_v20  ;;  %v1579_v24 = vld [vmem:[#allocation5 + $0x38] sm:$0xff]  ;;  %v1581_v25 = vld [vmem:[#allocation5 + $0x30] sm:$0xff] }
  0x2b   :  { %v279_v23 = vmul.f32 %v1573_v21, %v1573_v21  ;;  %v274_v26 = vmul.f32 %v1579_v24, %v1579_v24  ;;  %v273_v27 = vmul.f32 %v1581_v25, %v1581_v25  ;;  %v1587_v28 = vld [vmem:[#allocation5 + $0x78] sm:$0xff]  ;;  %v1589_v29 = vld [vmem:[#allocation5 + $0x70] sm:$0xff]  ;;  %v1595_v32 = vld [vmem:[#allocation2 + $0x8] sm:$0xff]  ;;  %p1455_p5 = por %p1454_p4, %p1453_p3 }
  0x2c   :  { %v282_v30 = vmul.f32 %v1587_v28, %v1587_v28  ;;  %v281_v31 = vmul.f32 %v1589_v29, %v1589_v29  ;;  %v1597_v33 = vld [vmem:[#allocation2] sm:$0xff]  ;;  %v76_v34 = vmul.f32 %v1595_v32, %v1595_v32  ;;  %v1603_v36 = vld [vmem:[#allocation2 + $0x48] sm:$0xff]  ;;  %v1611_v40 = vld [vmem:[#allocation2 + $0x18] sm:$0xff] }
  0x2d   :  { %301 = vadd.xlane.f32.xlu1 %v276_v6  ;;  %v75_v35 = vmul.f32 %v1597_v33, %v1597_v33  ;;  %v1605_v37 = vld [vmem:[#allocation2 + $0x40] sm:$0xff]  ;;  %v84_v38 = vmul.f32 %v1603_v36, %v1603_v36  ;;  %v1613_v41 = vld [vmem:[#allocation2 + $0x10] sm:$0xff]  ;;  %v78_v42 = vmul.f32 %v1611_v40, %v1611_v40  ;;  %v1619_v44 = vld [vmem:[#allocation2 + $0x58] sm:$0xff]  ;;  %p1456_p6 = pnand %p1455_p5, %p1449_p2 }
  0x2e   :  { %285 = vadd.xlane.f32.xlu0 %v268_v7  ;;  %v83_v39 = vmul.f32 %v1605_v37, %v1605_v37  ;;  %v77_v43 = vmul.f32 %v1613_v41, %v1613_v41  ;;  %v1621_v45 = vld [vmem:[#allocation2 + $0x50] sm:$0xff]  ;;  %v86_v46 = vmul.f32 %v1619_v44, %v1619_v44  ;;  %v1627_v48 = vld [vmem:[#allocation2 + $0x28] sm:$0xff]  ;;  %v1629_v49 = vld [vmem:[#allocation2 + $0x20] sm:$0xff] }
  0x2f   :  { %v85_v47 = vmul.f32 %v1621_v45, %v1621_v45  ;;  %v80_v50 = vmul.f32 %v1627_v48, %v1627_v48  ;;  %v79_v51 = vmul.f32 %v1629_v49, %v1629_v49  ;;  %v1635_v52 = vld [vmem:[#allocation2 + $0x68] sm:$0xff]  ;;  %v1637_v53 = vld [vmem:[#allocation2 + $0x60] sm:$0xff]  ;;  %v1643_v56 = vld [vmem:[#allocation2 + $0x38] sm:$0xff] }
  0x30   :  { %v88_v54 = vmul.f32 %v1635_v52, %v1635_v52  ;;  %v87_v55 = vmul.f32 %v1637_v53, %v1637_v53  ;;  %v1645_v57 = vld [vmem:[#allocation2 + $0x30] sm:$0xff]  ;;  %v82_v58 = vmul.f32 %v1643_v56, %v1643_v56  ;;  %v1651_v60 = vld [vmem:[#allocation2 + $0x78] sm:$0xff] }
  0x31   :  { %289 = vadd.xlane.f32.xlu1 %v270_v10  ;;  %v81_v59 = vmul.f32 %v1645_v57, %v1645_v57  ;;  %2682 = vst [vmem:[#allocation11_spill] sm:$0xff] %v1651_v60  ;;  %v1653_v61 = vld [vmem:[#allocation2 + $0x70] sm:$0xff]  ;;  %v90_v62 = vmul.f32 %v1651_v60, %v1651_v60 }
  0x32   :  { %287 = vadd.xlane.f32.xlu0 %v269_v11  ;;  %v89_v63 = vmul.f32 %v1653_v61, %v1653_v61 }
  0x35   :  { %305 = vadd.xlane.f32.xlu1 %v278_v14 }
  0x36   :  { %303 = vadd.xlane.f32.xlu0 %v277_v15 }
  0x39   :  { %293 = vadd.xlane.f32.xlu1 %v272_v18 }
  0x3a   :  { %291 = vadd.xlane.f32.xlu0 %v271_v19 }
  0x3d   :  { %309 = vadd.xlane.f32.xlu1 %v280_v22 }
  0x3e   :  { %307 = vadd.xlane.f32.xlu0 %v279_v23 }
  0x41   :  { %297 = vadd.xlane.f32.xlu1 %v274_v26 }
  0x42   :  { %295 = vadd.xlane.f32.xlu0 %v273_v27 }
  0x45   :  { %313 = vadd.xlane.f32.xlu1 %v282_v30 }
  0x46   :  { %311 = vadd.xlane.f32.xlu0 %v281_v31 }
  0x49   :  { %93 = vadd.xlane.f32.xlu1 %v76_v34 }
  0x4a   :  { %91 = vadd.xlane.f32.xlu0 %v75_v35 }
  0x4d   :  { %109 = vadd.xlane.f32.xlu1 %v84_v38 }
  0x4e   :  { %107 = vadd.xlane.f32.xlu0 %v83_v39 }
  0x51   :  { %97 = vadd.xlane.f32.xlu1 %v78_v42 }
  0x52   :  { %95 = vadd.xlane.f32.xlu0 %v77_v43 }
  0x55   :  { %113 = vadd.xlane.f32.xlu1 %v86_v46 }
  0x56   :  { %111 = vadd.xlane.f32.xlu0 %v85_v47 }
  0x59   :  { %101 = vadd.xlane.f32.xlu1 %v80_v50 }
  0x5a   :  { %99 = vadd.xlane.f32.xlu0 %v79_v51 }
  0x5d   :  { %117 = vadd.xlane.f32.xlu1 %v88_v54 }
  0x5e   :  { %115 = vadd.xlane.f32.xlu0 %v87_v55 }
  0x61   :  { %105 = vadd.xlane.f32.xlu1 %v82_v58 }
  0x62   :  { %103 = vadd.xlane.f32.xlu0 %v81_v59 }
  0x65   :  { %121 = vadd.xlane.f32.xlu1 %v90_v62 }
  0x66   :  { %119 = vadd.xlane.f32.xlu0 %v89_v63 }
  0xb6   :  { %v300_v3 = vpop.xlane.xlu1 %299 }
  0xb7   :  { %v284_v4 = vpop.xlane.xlu0 %283  ;;  %1212 = vrsqrt.f32 %v300_v3  ;;  %vm373_vm0 = vcmp.eq.f32.partialorder %v300_v3, inf  ;;  %vm375_vm1 = vcmp.eq.f32.partialorder %v300_v3, 0.0  ;;  %v376_v26 = vand.u32 2147483648, %v300_v3 }
  0xb8   :  { %1214 = vrsqrt.f32 %v284_v4  ;;  %vm317_vm2 = vcmp.eq.f32.partialorder %v284_v4, inf  ;;  %vm319_vm3 = vcmp.eq.f32.partialorder %v284_v4, 0.0  ;;  %v320_v27 = vand.u32 2147483648, %v284_v4 }
  0xba   :  { %v1659_v6 = vpop.xlane.xlu1 %301 }
  0xbb   :  { %v1661_v7 = vpop.xlane.xlu0 %285  ;;  %1216 = vrsqrt.f32 %v1659_v6  ;;  %vm380_vm4 = vcmp.eq.f32.partialorder %v1659_v6, inf  ;;  %v383_v30 = vand.u32 2147483648, %v1659_v6 }
  0xbc   :  { %1218 = vrsqrt.f32 %v1661_v7  ;;  %v327_v31 = vand.u32 2147483648, %v1661_v7  ;;  %vm324_vm6 = vcmp.eq.f32.partialorder %v1661_v7, inf  ;;  %vm326_vm12 = vcmp.eq.f32.partialorder %v1661_v7, 0.0 }
  0xbe   :  { %v290_v10 = vpop.xlane.xlu1 %289 }
  0xbf   :  { %v1665_v11 = vpop.xlane.xlu0 %287  ;;  %1220 = vrsqrt.f32 %v290_v10  ;;  %vm338_vm5 = vcmp.eq.f32.partialorder %v290_v10, inf  ;;  %vm340_vm7 = vcmp.eq.f32.partialorder %v290_v10, 0.0  ;;  %v341_v42 = vand.u32 2147483648, %v290_v10 }
  0xc0   :  { %1222 = vrsqrt.f32 %v1665_v11  ;;  %vm331_vm8 = vcmp.eq.f32.partialorder %v1665_v11, inf  ;;  %vm333_vm9 = vcmp.eq.f32.partialorder %v1665_v11, 0.0  ;;  %v334_v50 = vand.u32 2147483648, %v1665_v11 }
  0xc1   :  { %v1213_v14 = vpop.eup %1212 }
  0xc2   :  { %v1215_v15 = vpop.eup %1214  ;;  %v1668_v18 = vpop.xlane.xlu1 %305  ;;  %v372_v23 = vmul.f32 %v1213_v14, %v300_v3 }
  0xc3   :  { %v1670_v19 = vpop.xlane.xlu0 %303  ;;  %v316_v22 = vmul.f32 %v1215_v15, %v284_v4  ;;  %1224 = vrsqrt.f32 %v1668_v18  ;;  %vm394_vm10 = vcmp.eq.f32.partialorder %v1668_v18, inf  ;;  %vm396_vm11 = vcmp.eq.f32.partialorder %v1668_v18, 0.0 }
  0xc4   :  { %1226 = vrsqrt.f32 %v1670_v19  ;;  %v374_v46 = vsel %vm373_vm0, %v300_v3, %v372_v23  ;;  %v397_v51 = vand.u32 2147483648, %v1668_v18  ;;  %vm387_vm13 = vcmp.eq.f32.partialorder %v1670_v19, inf }
  0xc5   :  { %v1217_v38 = vpop.eup %1216  ;;  %v318_v39 = vsel %vm317_vm2, %v284_v4, %v316_v22  ;;  %v1700_v14 = vsel %vm375_vm1, %v376_v26, %v374_v46  ;;  %vm389_vm14 = vcmp.eq.f32.partialorder %v1670_v19, 0.0  ;;  %v390_v23 = vand.u32 2147483648, %v1670_v19 }
  0xc6   :  { %v1677_v34 = vpop.xlane.xlu1 %293  ;;  %v1219_v43 = vpop.eup %1218  ;;  %v321_v55 = vsel %vm319_vm3, %v320_v27, %v318_v39  ;;  %v379_v58 = vmul.f32 %v1217_v38, %v1659_v6  ;;  %vm382_vm3 = vcmp.eq.f32.partialorder %v1659_v6, 0.0 }
  0xc7   :  { %v1679_v35 = vpop.xlane.xlu0 %291  ;;  %1228 = vrsqrt.f32 %v1677_v34  ;;  %v323_v4 = vmul.f32 %v1219_v43, %v1661_v7  ;;  %v1709_v38 = vadd.f32 1e-06, %v321_v55  ;;  %vm352_vm15 = vcmp.eq.f32.partialorder %v1677_v34, inf }
  0xc8   :  { %1230 = vrsqrt.f32 %v1679_v35  ;;  %v1719_v43 = vsel %vm380_vm4, %v1659_v6, %v379_v58  ;;  %vm354_vm0 = vcmp.eq.f32.partialorder %v1677_v34, 0.0  ;;  %vm345_vm1 = vcmp.eq.f32.partialorder %v1679_v35, inf }
  0xc9   :  { %v1221_v47 = vpop.eup %1220  ;;  %v325_v58 = vsel %vm324_vm6, %v1661_v7, %v323_v4  ;;  %vm347_vm2 = vcmp.eq.f32.partialorder %v1679_v35, 0.0 }
  0xca   :  { %v1223_v54 = vpop.eup %1222  ;;  %v337_v59 = vmul.f32 %v1221_v47, %v290_v10  ;;  %v1695_v62 = vpop.xlane.xlu1 %309 }
  0xcb   :  { %v1697_v63 = vpop.xlane.xlu0 %307  ;;  %v330_v15 = vmul.f32 %v1223_v54, %v1665_v11  ;;  %1232 = vrsqrt.f32 %v1695_v62  ;;  %vm408_vm4 = vcmp.eq.f32.partialorder %v1695_v62, inf }
  0xcc   :  { %v339_v22 = vsel %vm338_vm5, %v290_v10, %v337_v59  ;;  %1234 = vrsqrt.f32 %v1697_v63  ;;  %vm410_vm5 = vcmp.eq.f32.partialorder %v1695_v62, 0.0  ;;  %vm401_vm6 = vcmp.eq.f32.partialorder %v1697_v63, inf }
  0xcd   :  { %v1225_v27 = vpop.eup %1224  ;;  %v342_v3 = vsel %vm340_vm7, %v341_v42, %v339_v22  ;;  %v332_v26 = vsel %vm331_vm8, %v1665_v11, %v330_v15  ;;  %vm403_vm7 = vcmp.eq.f32.partialorder %v1697_v63, 0.0 }
  0xce   :  { %v1227_v39 = vpop.eup %1226  ;;  %v430_v46 = vadd.f32 1e-06, %v342_v3  ;;  %v335_v47 = vsel %vm333_vm9, %v334_v50, %v332_v26  ;;  %v393_v54 = vmul.f32 %v1225_v27, %v1668_v18  ;;  %v1724_v10 = vpop.xlane.xlu1 %297  ;;  %v355_v50 = vand.u32 2147483648, %v1677_v34 }
  0xcf   :  { %v1726_v42 = vpop.xlane.xlu0 %295  ;;  %v429_v55 = vadd.f32 1e-06, %v335_v47  ;;  %v386_v59 = vmul.f32 %v1227_v39, %v1670_v19  ;;  %1236 = vrsqrt.f32 %v1724_v10  ;;  %vm366_vm8 = vcmp.eq.f32.partialorder %v1724_v10, inf }
  0xd0   :  { %v395_v11 = vsel %vm394_vm10, %v1668_v18, %v393_v54  ;;  %1238 = vrcp.f32 %v430_v46  ;;  %v328_v18 = vsel %vm326_vm12, %v327_v31, %v325_v58  ;;  %v348_v54 = vand.u32 2147483648, %v1679_v35 }
  0xd1   :  { %v1229_v15 = vpop.eup %1228  ;;  %v398_v22 = vsel %vm396_vm11, %v397_v51, %v395_v11  ;;  %v388_v27 = vsel %vm387_vm13, %v1670_v19, %v386_v59  ;;  %1240 = vrsqrt.f32 %v1726_v42  ;;  %vm368_vm9 = vcmp.eq.f32.partialorder %v1724_v10, 0.0 }
  0xd2   :  { %v1231_v4 = vpop.eup %1230  ;;  %v438_v3 = vadd.f32 1e-06, %v398_v22  ;;  %v391_v26 = vsel %vm389_vm14, %v390_v23, %v388_v27  ;;  %v351_v39 = vmul.f32 %v1229_v15, %v1677_v34  ;;  %v1749_v47 = vpop.xlane.xlu1 %313  ;;  %1242 = vrcp.f32 %v429_v55 }
  0xd3   :  { %v1751_v46 = vpop.xlane.xlu0 %311  ;;  %v437_v51 = vadd.f32 1e-06, %v391_v26  ;;  %v344_v19 = vmul.f32 %v1231_v4, %v1679_v35  ;;  %vm359_vm10 = vcmp.eq.f32.partialorder %v1726_v42, inf  ;;  %vm361_vm11 = vcmp.eq.f32.partialorder %v1726_v42, 0.0 }
  0xd4   :  { %1244 = vrcp.f32 %v438_v3  ;;  %v353_v23 = vsel %vm352_vm15, %v1677_v34, %v351_v39  ;;  %v404_v3 = vand.u32 2147483648, %v1697_v63  ;;  %vm422_vm12 = vcmp.eq.f32.partialorder %v1749_v47, inf }
  0xd5   :  { %v1233_v59 = vpop.eup %1232  ;;  %1246 = vrcp.f32 %v437_v51  ;;  %v356_v11 = vsel %vm354_vm0, %v355_v50, %v353_v23  ;;  %v346_v7 = vsel %vm345_vm1, %v1679_v35, %v344_v19  ;;  %v411_v50 = vand.u32 2147483648, %v1695_v62 }
  0xd6   :  { %v1235_v31 = vpop.eup %1234  ;;  %v432_v55 = vadd.f32 1e-06, %v356_v11  ;;  %v349_v58 = vsel %vm347_vm2, %v348_v54, %v346_v7  ;;  %v407_v15 = vmul.f32 %v1233_v59, %v1695_v62  ;;  %1248 = vrsqrt.f32 %v1749_v47  ;;  %v1774_v22 = vpop.xlane.xlu1 %93 }
  0xd7   :  { %v1776_v27 = vpop.xlane.xlu0 %91  ;;  %v431_v34 = vadd.f32 1e-06, %v349_v58  ;;  %v400_v4 = vmul.f32 %v1235_v31, %v1697_v63  ;;  %1250 = vrsqrt.f32 %v1751_v46  ;;  %vm424_vm13 = vcmp.eq.f32.partialorder %v1749_v47, 0.0 }
  0xd8   :  { %1252 = vrcp.f32 %v432_v55  ;;  %v409_v35 = vsel %vm408_vm4, %v1695_v62, %v407_v15  ;;  %v369_v62 = vand.u32 2147483648, %v1724_v10  ;;  %v384_v55 = vsel %vm382_vm3, %v383_v30, %v1719_v43 }
  0xd9   :  { %v1237_v26 = vpop.eup %1236  ;;  %1254 = vrcp.f32 %v431_v34  ;;  %v412_v39 = vsel %vm410_vm5, %v411_v50, %v409_v35  ;;  %v402_v51 = vsel %vm401_vm6, %v1697_v63, %v400_v4  ;;  %v428_v34 = vadd.f32 1e-06, %v328_v18 }
  0xda   :  { %v440_v19 = vadd.f32 1e-06, %v412_v39  ;;  %v405_v23 = vsel %vm403_vm7, %v404_v3, %v402_v51  ;;  %v365_v54 = vmul.f32 %v1237_v26, %v1724_v10  ;;  %1256 = vrsqrt.f32 %v1774_v22  ;;  %v1792_v59 = vpop.xlane.xlu1 %109  ;;  %v1796_v7 = vpop.eup %1238 }
  0xdb   :  { %v1794_v11 = vpop.xlane.xlu0 %107  ;;  %v439_v31 = vadd.f32 1e-06, %v405_v23  ;;  %1258 = vrsqrt.f32 %v1776_v27  ;;  %v1241_v63 = vpop.eup %1240  ;;  %v362_v26 = vand.u32 2147483648, %v1726_v42  ;;  %v435_v39 = vadd.f32 1e-06, %v1700_v14 }
  0xdc   :  { %1260 = vrcp.f32 %v440_v19  ;;  %v367_v58 = vsel %vm366_vm8, %v1724_v10, %v365_v54  ;;  %v1243_v15 = vpop.eup %1242  ;;  %v358_v4 = vmul.f32 %v1241_v63, %v1726_v42  ;;  %v436_v51 = vadd.f32 1e-06, %v384_v55 }
  0xdd   :  { %1262 = vrcp.f32 %v439_v31  ;;  %v370_v50 = vsel %vm368_vm9, %v369_v62, %v367_v58  ;;  %vm415_vm14 = vcmp.eq.f32.partialorder %v1751_v46, inf  ;;  %vm417_vm15 = vcmp.eq.f32.partialorder %v1751_v46, 0.0 }
  0xde   :  { %v1809_v35 = vpop.eup %1244  ;;  %v434_v3 = vadd.f32 1e-06, %v370_v50  ;;  %1264 = vrsqrt.f32 %v1792_v59  ;;  %v1814_v6 = vpop.xlane.xlu1 %97  ;;  %v360_v10 = vsel %vm359_vm10, %v1726_v42, %v358_v4  ;;  %v425_v42 = vand.u32 2147483648, %v1749_v47 }
  0xdf   :  { %v1816_v30 = vpop.xlane.xlu0 %95  ;;  %v1818_v43 = vpop.eup %1246  ;;  %1266 = vrsqrt.f32 %v1794_v11  ;;  %v363_v19 = vsel %vm361_vm11, %v362_v26, %v360_v10  ;;  %vm146_vm0 = vcmp.eq.f32.partialorder %v1814_v6, inf  ;;  %vm125_vm4 = vcmp.eq.f32.partialorder %v1776_v27, inf }
  0xe0   :  { %v1249_v18 = vpop.eup %1248  ;;  %1268 = vrcp.f32 %v434_v3  ;;  %v433_v54 = vadd.f32 1e-06, %v363_v19  ;;  %vm139_vm1 = vcmp.eq.f32.partialorder %v1816_v30, inf  ;;  %vm132_vm6 = vcmp.eq.f32.partialorder %v1774_v22, inf }
  0xe1   :  { %v1251_v23 = vpop.eup %1250  ;;  %v421_v31 = vmul.f32 %v1249_v18, %v1749_v47  ;;  %1270 = vrcp.f32 %v1709_v38  ;;  %v418_v38 = vand.u32 2147483648, %v1751_v46  ;;  %vm181_vm10 = vcmp.eq.f32.partialorder %v1794_v11, inf }
  0xe2   :  { %v1827_v62 = vpop.eup %1252  ;;  %v414_v63 = vmul.f32 %v1251_v23, %v1751_v46  ;;  %1272 = vrcp.f32 %v428_v34  ;;  %v1832_v14 = vpop.xlane.xlu1 %113  ;;  %vm188_vm11 = vcmp.eq.f32.partialorder %v1792_v59, inf }
  0xe3   :  { %v1834_v55 = vpop.xlane.xlu0 %111  ;;  %v1836_v58 = vpop.eup %1254  ;;  %1274 = vrcp.f32 %v433_v54  ;;  %v423_v50 = vsel %vm422_vm12, %v1749_v47, %v421_v31  ;;  %vm202_vm2 = vcmp.eq.f32.partialorder %v1832_v14, inf }
  0xe4   :  { %v1257_v4 = vpop.eup %1256  ;;  %v426_v3 = vsel %vm424_vm13, %v425_v42, %v423_v50  ;;  %v416_v26 = vsel %vm415_vm14, %v1751_v46, %v414_v63  ;;  %1276 = vrcp.f32 %v435_v39  ;;  %v501_v46 = vmul.f32 %v1243_v15, %v1549_v9 }
  0xe5   :  { %v1259_v34 = vpop.eup %1258  ;;  %v442_v10 = vadd.f32 1e-06, %v426_v3  ;;  %v419_v18 = vsel %vm417_vm15, %v418_v38, %v416_v26  ;;  %1278 = vrcp.f32 %v436_v51  ;;  %v502_v39 = vmul.f32 %v1796_v7, %v1547_v8 }
  0xe6   :  { %v1843_v19 = vpop.eup %1260  ;;  %v441_v23 = vadd.f32 1e-06, %v419_v18  ;;  %1280 = vrsqrt.f32 %v1814_v6  ;;  %v1846_v47 = vpop.xlane.xlu1 %101  ;;  %v1867_v15 = vmul.f32 %v1257_v4, %v1774_v22  ;;  %v1870_v18 = vmul.f32 %v1259_v34, %v1776_v27 }
  0xe7   :  { %v1848_v54 = vpop.xlane.xlu0 %99  ;;  %v1263_v31 = vpop.eup %1262  ;;  %1282 = vrcp.f32 %v442_v10  ;;  %v1875_v10 = vpack.c.bf16 %v502_v39, %v501_v46  ;;  %v509_v26 = vmul.f32 %v1818_v43, %v1557_v13  ;;  %v510_v51 = vmul.f32 %v1809_v35, %v1555_v12 }
  0xe8   :  { %v1265_v42 = vpop.eup %1264  ;;  %1284 = vrcp.f32 %v441_v23  ;;  %v198_v12 = vand.u32 2147483648, %v1834_v55  ;;  %vm195_vm3 = vcmp.eq.f32.partialorder %v1834_v55, inf  ;;  %v504_v39 = vmul.f32 %v1827_v62, %v1563_v16 }
  0xe9   :  { %v1267_v63 = vpop.eup %1266  ;;  %1286 = vrsqrt.f32 %v1816_v30  ;;  %v1887_v46 = vmul.f32 %v1265_v42, %v1792_v59  ;;  %v503_v42 = vmul.f32 %v1836_v58, %v1565_v17  ;;  %v1909_v50 = vpack.c.bf16 %v510_v51, %v509_v26 }
  0xea   :  { %v1856_v38 = vpop.eup %1268  ;;  %1288 = vrsqrt.f32 %v1832_v14  ;;  %v1862_v9 = vpop.xlane.xlu1 %117  ;;  %v1890_v13 = vmul.f32 %v1267_v63, %v1794_v11  ;;  %vm160_vm5 = vcmp.eq.f32.partialorder %v1846_v47, inf  ;;  %vm153_vm7 = vcmp.eq.f32.partialorder %v1848_v54, inf }
  0xeb   :  { %v1864_v8 = vpop.xlane.xlu0 %115  ;;  %v1271_v7 = vpop.eup %1270  ;;  %1290 = vrsqrt.f32 %v1834_v55  ;;  %v511_v17 = vmul.f32 %v1263_v31, %v1573_v21  ;;  %v156_v62 = vand.u32 2147483648, %v1848_v54  ;;  %vm216_vm8 = vcmp.eq.f32.partialorder %v1862_v9, inf }
  0xec   :  { %v1273_v3 = vpop.eup %1272  ;;  %1292 = vrsqrt.f32 %v1846_v47  ;;  %v499_v34 = vmul.f32 %v1271_v7, %v1533_v1  ;;  %v1926_v21 = vpack.c.bf16 %v504_v39, %v503_v42  ;;  %vm209_vm9 = vcmp.eq.f32.partialorder %v1864_v8, inf }
  0xed   :  { %v1275_v4 = vpop.eup %1274  ;;  %v500_v23 = vmul.f32 %v1273_v3, %v1541_v5  ;;  %1294 = vrsqrt.f32 %v1848_v54  ;;  %v506_v42 = vmul.f32 %v1856_v38, %v1579_v24  ;;  %vm148_vm14 = vcmp.eq.f32.partialorder %v1814_v6, 0.0 }
  0xee   :  { %v1277_v60 = vpop.eup %1276  ;;  %1296 = vrsqrt.f32 %v1862_v9  ;;  %v1896_v1 = vpop.xlane.xlu1 %105  ;;  %vm141_vm15 = vcmp.eq.f32.partialorder %v1816_v30, 0.0 }
  0xef   :  { %v1898_v5 = vpop.xlane.xlu0 %103  ;;  %v1279_v35 = vpop.eup %1278  ;;  %v515_v43 = vpack.c.bf16 %v500_v23, %v499_v34  ;;  %1298 = vrsqrt.f32 %v1864_v8  ;;  %v507_v3 = vmul.f32 %v1277_v60, %v1531_v0  ;;  %v163_v23 = vand.u32 2147483648, %v1846_v47 }
  0xf0   :  { %v1281_v63 = vpop.eup %1280  ;;  %v508_v7 = vmul.f32 %v1279_v35, %v1535_v2  ;;  %v512_v0 = vmul.f32 %v1843_v19, %v1571_v20  ;;  %1300 = vrsqrt.f32 %v1896_v1  ;;  %v219_v20 = vand.u32 2147483648, %v1862_v9 }
  0xf1   :  { %v1283_v34 = vpop.eup %1282  ;;  %1175 = vmatprep.subr.bf16.mxu0 %v515_v43  ;;  %v145_v16 = vmul.f32 %v1281_v63, %v1814_v6  ;;  %1302 = vrsqrt.f32 %v1898_v5  ;;  %v212_v19 = vand.u32 2147483648, %v1864_v8  ;;  %vm174_vm12 = vcmp.eq.f32.partialorder %v1896_v1, inf }
  0xf2   :  { %v1285_v2 = vpop.eup %1284  ;;  %v519_v60 = vpack.c.bf16 %v508_v7, %v507_v3  ;;  %1176 = vmatpush3.bf16.xpose.msra.mxu0 %v515_v43  ;;  %v1923_v58 = vpop.xlane.xlu1 %121  ;;  %v505_v43 = vmul.f32 %v1275_v4, %v1581_v25  ;;  %v1946_v7 = vpack.c.bf16 %v512_v0, %v511_v17  ;;  %vm167_vm13 = vcmp.eq.f32.partialorder %v1898_v5, inf }
  0xf3   :  { %v1287_v51 = vpop.eup %1286  ;;  %1177 = vmatprep.subr.bf16.mxu0 %v1875_v10  ;;  %v1931_v31 = vpop.xlane.xlu0 %119  ;;  %1304 = vrsqrt.f32 %v1923_v58  ;;  %v1943_v63 = vsel %vm146_vm0, %v1814_v6, %v145_v16  ;;  %vm230_vm0 = vcmp.eq.f32.partialorder %v1923_v58, inf  ;;  %v513_v4 = vmul.f32 %v1285_v2, %v1589_v29 }
  0xf4   :  { %v1289_v26 = vpop.eup %1288  ;;  %1191 = vmatprep.subr.bf16.mxu1 %v519_v60  ;;  %v138_v35 = vmul.f32 %v1287_v51, %v1816_v30  ;;  %1306 = vrsqrt.f32 %v1931_v31 }
  0xf5   :  { %v1291_v39 = vpop.eup %1290  ;;  %1192 = vmatpush3.bf16.xpose.msra.mxu1 %v519_v60  ;;  %v201_v3 = vmul.f32 %v1289_v26, %v1832_v14  ;;  %v1967_v26 = vpack.c.bf16 %v506_v42, %v505_v43 }
  0xf6   :  { %v1293_v24 = vpop.eup %1292  ;;  %v194_v38 = vmul.f32 %v1291_v39, %v1834_v55  ;;  %1193 = vmatprep.subr.bf16.mxu1 %v1909_v50  ;;  %v140_v17 = vsel %vm139_vm1, %v1816_v30, %v138_v35  ;;  %vm155_vm1 = vcmp.eq.f32.partialorder %v1848_v54, 0.0 }
  0xf7   :  { %v1295_v60 = vpop.eup %1294  ;;  %v1964_v0 = vsel %vm202_vm2, %v1832_v14, %v201_v3  ;;  %v159_v51 = vmul.f32 %v1293_v24, %v1846_v47  ;;  %vm197_vm2 = vcmp.eq.f32.partialorder %v1834_v55, 0.0  ;;  %v514_v24 = vmul.f32 %v1283_v34, %v1587_v28 }
  0xf8   :  { %v1297_v39 = vpop.eup %1296  ;;  %v1972_v16 = vsel %vm195_vm3, %v1834_v55, %v194_v38  ;;  %v152_v25 = vmul.f32 %v1295_v60, %v1848_v54  ;;  %v126_v38 = vsel %vm125_vm4, %v1776_v27, %v1870_v18  ;;  %vm223_vm3 = vcmp.eq.f32.partialorder %v1931_v31, inf }
  0xf9   :  { %v1299_v3 = vpop.eup %1298  ;;  %v1983_v43 = vsel %vm160_vm5, %v1846_v47, %v159_v51  ;;  %v215_v42 = vmul.f32 %v1297_v39, %v1862_v9  ;;  %vm127_vm5 = vcmp.eq.f32.partialorder %v1776_v27, 0.0  ;;  %v133_v28 = vsel %vm132_vm6, %v1774_v22, %v1867_v15 }
  0xfa   :  { %1178 = vmatpush3.bf16.xpose.msra.mxu0 %v1875_v10  ;;  %v154_v29 = vsel %vm153_vm7, %v1848_v54, %v152_v25  ;;  %v208_v2 = vmul.f32 %v1299_v3, %v1864_v8  ;;  %v1301_v34 = vpop.eup %1300  ;;  %vm211_vm7 = vcmp.eq.f32.partialorder %v1864_v8, 0.0  ;;  %v2009_v18 = vpack.c.bf16 %v514_v24, %v513_v4 }
  0xfb   :  { %1179 = vmatprep.subr.bf16.mxu0 %v1926_v21  ;;  %v217_v10 = vsel %vm216_vm8, %v1862_v9, %v215_v42  ;;  %v2683_v25 = vand.u32 2147483648, %v1776_v27  ;;  %vm134_vm6 = vcmp.eq.f32.partialorder %v1774_v22, 0.0  ;;  %v1303_v15 = vpop.eup %1302  ;;  %vm218_vm4 = vcmp.eq.f32.partialorder %v1862_v9, 0.0 }
  0xfc   :  { %v210_v51 = vsel %vm209_vm9, %v1864_v8, %v208_v2  ;;  %v173_v39 = vmul.f32 %v1301_v34, %v1896_v1  ;;  %v2684_v3 = vand.u32 2147483648, %v1774_v22  ;;  %v166_v27 = vmul.f32 %v1303_v15, %v1898_v5 }
  0xfd   :  { %v129_v60 = vsel %vm127_vm5, %v2683_v25, %v126_v38  ;;  %1194 = vmatpush3.bf16.xpose.msra.mxu1 %v1909_v50  ;;  %vm169_vm8 = vcmp.eq.f32.partialorder %v1898_v5, 0.0  ;;  %v182_v24 = vsel %vm181_vm10, %v1794_v11, %v1890_v13  ;;  %vm183_vm9 = vcmp.eq.f32.partialorder %v1794_v11, 0.0  ;;  %v1305_v38 = vpop.eup %1304 }
  0xfe   :  { %v136_v42 = vsel %vm134_vm6, %v2684_v3, %v133_v28  ;;  %v235_v35 = vadd.f32 1e-06, %v129_v60  ;;  %1195 = vmatprep.subr.bf16.mxu1 %v1946_v7  ;;  %v175_v22 = vsel %vm174_vm12, %v1896_v1, %v173_v39  ;;  %vm176_vm5 = vcmp.eq.f32.partialorder %v1896_v1, 0.0 }
  0xff   :  { %v236_v4 = vadd.f32 1e-06, %v136_v42  ;;  %v2685_v50 = vand.u32 2147483648, %v1794_v11  ;;  %v189_v13 = vsel %vm188_vm11, %v1792_v59, %v1887_v46  ;;  %v168_v28 = vsel %vm167_vm13, %v1898_v5, %v166_v27 }
 0x100   :  { %1308 = vrcp.f32 %v235_v35  ;;  %v229_v34 = vmul.f32 %v1305_v38, %v1923_v58  ;;  %vm232_vm10 = vcmp.eq.f32.partialorder %v1923_v58, 0.0  ;;  %vm190_vm12 = vcmp.eq.f32.partialorder %v1792_v59, 0.0  ;;  %v1307_v35 = vpop.eup %1306 }
 0x101   :  { %v185_v2 = vsel %vm183_vm9, %v2685_v50, %v182_v24  ;;  %1310 = vrcp.f32 %v236_v4  ;;  %v2686_v11 = vand.u32 2147483648, %v1792_v59  ;;  %v2687_v15 = vand.u32 2147483648, %v1816_v30 }
 0x102   :  { %v243_v60 = vadd.f32 1e-06, %v185_v2  ;;  %v2688_v39 = vand.u32 2147483648, %v1814_v6  ;;  %v231_v42 = vsel %vm230_vm0, %v1923_v58, %v229_v34  ;;  %v222_v27 = vmul.f32 %v1307_v35, %v1931_v31  ;;  %1180 = vmatpush3.bf16.xpose.msra.mxu0 %v1926_v21 }
 0x103   :  { %v192_v25 = vsel %vm190_vm12, %v2686_v11, %v189_v13  ;;  %v143_v46 = vsel %vm141_vm15, %v2687_v15, %v140_v17  ;;  %v199_v30 = vsel %vm197_vm2, %v198_v12, %v1972_v16  ;;  %v2689_v6 = vand.u32 2147483648, %v1832_v14  ;;  %1181 = vmatprep.subr.bf16.mxu0 %v1967_v26 }
 0x104   :  { %v150_v3 = vsel %vm148_vm14, %v2688_v39, %v1943_v63  ;;  %v244_v59 = vadd.f32 1e-06, %v192_v25  ;;  %v237_v4 = vadd.f32 1e-06, %v143_v46  ;;  %1312 = vrcp.f32 %v243_v60 }
 0x105   :  { %v238_v24 = vadd.f32 1e-06, %v150_v3  ;;  %vm2690_vm11 = vcmp.eq.f32.partialorder %v1832_v14, 0.0  ;;  %v224_v21 = vsel %vm223_vm3, %v1931_v31, %v222_v27  ;;  %v245_v17 = vadd.f32 1e-06, %v199_v30  ;;  %1196 = vmatpush3.bf16.xpose.msra.mxu1 %v1946_v7 }
 0x106   :  { %v206_v63 = vsel %vm2690_vm11, %v2689_v6, %v1964_v0  ;;  %1314 = vrcp.f32 %v244_v59  ;;  %v157_v55 = vsel %vm155_vm1, %v156_v62, %v154_v29  ;;  %vm2691_vm13 = vcmp.eq.f32.partialorder %v1846_v47, 0.0  ;;  %1197 = vmatprep.subr.bf16.mxu1 %v2009_v18 }
 0x107   :  { %v246_v38 = vadd.f32 1e-06, %v206_v63  ;;  %1316 = vrcp.f32 %v237_v4  ;;  %v164_v14 = vsel %vm2691_vm13, %v163_v23, %v1983_v43  ;;  %v213_v12 = vsel %vm211_vm7, %v212_v19, %v210_v51 }
 0x108   :  { %1318 = vrcp.f32 %v238_v24  ;;  %v239_v16 = vadd.f32 1e-06, %v157_v55  ;;  %v240_v0 = vadd.f32 1e-06, %v164_v14  ;;  %v220_v54 = vsel %vm218_vm4, %v219_v20, %v217_v10 }
 0x109   :  { %vm225_vm14 = vcmp.eq.f32.partialorder %v1931_v31, 0.0  ;;  %1320 = vrcp.f32 %v245_v17  ;;  %v247_v47 = vadd.f32 1e-06, %v213_v12  ;;  %v2692_v23 = vand.u32 2147483648, %v1898_v5 }
 0x10a   :  { %1322 = vrcp.f32 %v246_v38  ;;  %v248_v62 = vadd.f32 1e-06, %v220_v54  ;;  %v2693_v19 = vand.u32 2147483648, %v1896_v1  ;;  %v2694_v9 = vand.u32 2147483648, %v1931_v31  ;;  %v1309_v43 = vpop.eup %1308  ;;  %1182 = vmatpush3.bf16.xpose.msra.mxu0 %v1967_v26 }
 0x10b   :  { %v171_v8 = vsel %vm169_vm8, %v2692_v23, %v168_v28  ;;  %1324 = vrcp.f32 %v239_v16  ;;  %v2695_v10 = vand.u32 2147483648, %v1923_v58  ;;  %v1311_v5 = vpop.eup %1310  ;;  %v459_v50 = vmul.f32 10.0, %v1309_v43  ;;  %v2696_v43 = vld [vmem:[#allocation11_spill] sm:$0xff] }
 0x10c   :  { %v178_v7 = vsel %vm176_vm5, %v2693_v19, %v175_v22  ;;  %v227_v20 = vsel %vm225_vm14, %v2694_v9, %v224_v21  ;;  %v241_v29 = vadd.f32 1e-06, %v171_v8  ;;  %1326 = vrcp.f32 %v240_v0 }
 0x10d   :  { %v234_v51 = vsel %vm232_vm10, %v2695_v10, %v231_v42  ;;  %v242_v2 = vadd.f32 1e-06, %v178_v7  ;;  %v460_v13 = vmul.f32 10.0, %v1311_v5  ;;  %1328 = vrcp.f32 %v247_v47  ;;  %1198 = vmatpush3.bf16.xpose.msra.mxu1 %v2009_v18 }
 0x10e   :  { %v249_v1 = vadd.f32 1e-06, %v227_v20  ;;  %v475_v31 = vmul.f32 %v459_v50, %v1597_v33  ;;  %1330 = vrcp.f32 %v248_v62  ;;  %v250_v22 = vadd.f32 1e-06, %v234_v51  ;;  %v1313_v28 = vpop.eup %1312 }
 0x10f   :  { %v476_v34 = vmul.f32 %v460_v13, %v1595_v32  ;;  %1332 = vrcp.f32 %v241_v29  ;;  %v467_v58 = vmul.f32 10.0, %v1313_v28  ;;  %vm653_vm15 = vcmask 523264  }
 0x110   :  { %v1315_v35 = vpop.eup %1314  ;;  %1334 = vrcp.f32 %v242_v2 }
 0x111   :  { %v1317_v11 = vpop.eup %1316  ;;  %v491_v25 = vpack.c.bf16 %v476_v34, %v475_v31  ;;  %v468_v60 = vmul.f32 10.0, %v1315_v35  ;;  %1336 = vrcp.f32 %v249_v1  ;;  %v483_v15 = vmul.f32 %v467_v58, %v1605_v37 }
 0x112   :  { %v1319_v26 = vpop.eup %1318  ;;  %v461_v46 = vmul.f32 10.0, %v1317_v11  ;;  %1338 = vrcp.f32 %v250_v22 }
 0x113   :  { %v1321_v33 = vpop.eup %1320  ;;  %1183 = vmatprep.mubr.bf16.mxu0 %v491_v25  ;;  %v484_v39 = vmul.f32 %v468_v60, %v1603_v36  ;;  %v462_v32 = vmul.f32 10.0, %v1319_v26 }
 0x114   :  { %v1323_v3 = vpop.eup %1322  ;;  %v477_v42 = vmul.f32 %v461_v46, %v1613_v41  ;;  %v469_v18 = vmul.f32 10.0, %v1321_v33 }
 0x115   :  { %v1325_v27 = vpop.eup %1324  ;;  %v495_v59 = vpack.c.bf16 %v484_v39, %v483_v15  ;;  %v478_v4 = vmul.f32 %v462_v32, %v1611_v40  ;;  %v470_v24 = vmul.f32 10.0, %v1323_v3 }
 0x116   :  { %v1327_v30 = vpop.eup %1326  ;;  %v485_v6 = vmul.f32 %v469_v18, %v1621_v45  ;;  %v463_v37 = vmul.f32 10.0, %v1325_v27 }
 0x117   :  { %v1329_v63 = vpop.eup %1328  ;;  %1199 = vmatprep.mubr.bf16.mxu1 %v495_v59  ;;  %v492_v21 = vpack.c.bf16 %v478_v4, %v477_v42  ;;  %v486_v17 = vmul.f32 %v470_v24, %v1619_v44  ;;  %v464_v36 = vmul.f32 10.0, %v1327_v30  ;;  %v846_v30 = vlaneseq }
 0x118   :  { %v1331_v38 = vpop.eup %1330  ;;  %v479_v55 = vmul.f32 %v463_v37, %v1629_v49  ;;  %v471_v41 = vmul.f32 10.0, %v1329_v63 }
 0x119   :  { %v1333_v14 = vpop.eup %1332  ;;  %1184 = vmatmul.mubr.bf16.vlgmr.msra.gmra.mrb[0].mxu0 %v492_v21  ;;  %v496_v12 = vpack.c.bf16 %v486_v17, %v485_v6  ;;  %v480_v40 = vmul.f32 %v464_v36, %v1627_v48  ;;  %v472_v16 = vmul.f32 10.0, %v1331_v38  ;;  %v2192_v6 = vand.u32 127, %v846_v30 }
 0x11a   :  { %v1335_v0 = vpop.eup %1334  ;;  %v487_v45 = vmul.f32 %v471_v41, %v1637_v53  ;;  %v465_v54 = vmul.f32 10.0, %v1333_v14 }
 0x11b   :  { %v1337_v47 = vpop.eup %1336  ;;  %1200 = vmatmul.mubr.bf16.vlgmr.msra.gmra.mrb[0].mxu1 %v496_v12  ;;  %v493_v23 = vpack.c.bf16 %v480_v40, %v479_v55  ;;  %v488_v44 = vmul.f32 %v472_v16, %v1635_v52  ;;  %v466_v8 = vmul.f32 10.0, %v1335_v0 }
 0x11c   :  { %v1339_v62 = vpop.eup %1338  ;;  %v481_v49 = vmul.f32 %v465_v54, %v1645_v57  ;;  %v473_v19 = vmul.f32 10.0, %v1337_v47 }
 0x11d   :  { %1187 = vmatprep.mubr.bf16.mxu0 %v493_v23  ;;  %v497_v7 = vpack.c.bf16 %v488_v44, %v487_v45  ;;  %v482_v9 = vmul.f32 %v466_v8, %v1643_v56  ;;  %v474_v48 = vmul.f32 10.0, %v1339_v62 }
 0x11e   :  { %v489_v20 = vmul.f32 %v473_v19, %v1653_v61 }
 0x11f   :  { %1203 = vmatprep.mubr.bf16.mxu1 %v497_v7  ;;  %v494_v53 = vpack.c.bf16 %v482_v9, %v481_v49  ;;  %v490_v29 = vmul.f32 %v474_v48, %v2696_v43 }
 0x121   :  { %1188 = vmatmul.mubr.bf16.gmra.mrb[4].mxu0 %v494_v53  ;;  %v498_v10 = vpack.c.bf16 %v490_v29, %v489_v20 }
 0x123   :  { %1204 = vmatmul.mubr.bf16.gmra.mrb[4].mxu1 %v498_v10 }
 0x1ec   :  { %v2128_v52 = vpop.f32.mrb[0].mxu0 }
 0x1ed   :  { %v2130_v51 = vpop.f32.mrb[1].mxu0  ;;  %v660_v57 = vsel %vm653_vm15, %v2128_v52, -inf }
 0x1ee   :  { %661 = vmax.xlane.f32.xlu0 %v660_v57  ;;  %v2134_v56 = vpop.f32.mrb[2].mxu0  ;;  %v2136_v5 = vpop.f32.mrb[0].mxu1  ;;  %v654_v34 = vsel %vm653_vm15, %v2130_v51, -inf }
 0x1ef   :  { %v2138_v61 = vpop.f32.mrb[3].mxu0  ;;  %v663_v50 = vsel %vm653_vm15, %v2134_v56, -inf  ;;  %v2142_v2 = vpop.f32.mrb[1].mxu1  ;;  %v684_v13 = vsel %vm653_vm15, %v2136_v5, -inf }
 0x1f0   :  { %664 = vmax.xlane.f32.xlu1 %v663_v50  ;;  %v2146_v1 = vpop.f32.mrb[2].mxu1  ;;  %v657_v25 = vsel %vm653_vm15, %v2138_v61, -inf  ;;  %v678_v46 = vsel %vm653_vm15, %v2142_v2, -inf }
 0x1f1   :  { %v2148_v31 = vpop.f32.mrb[3].mxu1  ;;  %v687_v22 = vsel %vm653_vm15, %v2146_v1, -inf }
 0x1f2   :  { %685 = vmax.xlane.f32.xlu0 %v684_v13  ;;  %v681_v39 = vsel %vm653_vm15, %v2148_v31, -inf }
 0x1f4   :  { %688 = vmax.xlane.f32.xlu1 %v687_v22  ;;  %v2152_v28 = vpop.f32.mrb[4].mxu0 }
 0x1f5   :  { %v2156_v35 = vpop.f32.mrb[5].mxu0  ;;  %v672_v32 = vsel %vm653_vm15, %v2152_v28, -inf }
 0x1f6   :  { %655 = vmax.xlane.f32.xlu0 %v654_v34  ;;  %v2158_v58 = vpop.f32.mrb[6].mxu0  ;;  %v2160_v11 = vpop.f32.mrb[4].mxu1  ;;  %v666_v42 = vsel %vm653_vm15, %v2156_v35, -inf }
 0x1f7   :  { %v2164_v60 = vpop.f32.mrb[7].mxu0  ;;  %v2166_v26 = vpop.f32.mrb[5].mxu1  ;;  %v675_v3 = vsel %vm653_vm15, %v2158_v58, -inf  ;;  %v696_v4 = vsel %vm653_vm15, %v2160_v11, -inf }
 0x1f8   :  { %658 = vmax.xlane.f32.xlu1 %v657_v25  ;;  %v2168_v15 = vpop.f32.mrb[6].mxu1  ;;  %v669_v18 = vsel %vm653_vm15, %v2164_v60, -inf  ;;  %v690_v27 = vsel %vm653_vm15, %v2166_v26, -inf }
 0x1f9   :  { %v2172_v33 = vpop.f32.mrb[7].mxu1  ;;  %v699_v24 = vsel %vm653_vm15, %v2168_v15, -inf }
 0x1fa   :  { %679 = vmax.xlane.f32.xlu0 %v678_v46  ;;  %v693_v59 = vsel %vm653_vm15, %v2172_v33, -inf }
 0x1fc   :  { %682 = vmax.xlane.f32.xlu1 %v681_v39 }
 0x1fe   :  { %673 = vmax.xlane.f32.xlu0 %v672_v32 }
 0x200   :  { %676 = vmax.xlane.f32.xlu1 %v675_v3 }
 0x202   :  { %667 = vmax.xlane.f32.xlu0 %v666_v42 }
 0x204   :  { %670 = vmax.xlane.f32.xlu1 %v669_v18 }
 0x206   :  { %691 = vmax.xlane.f32.xlu0 %v690_v27 }
 0x208   :  { %694 = vmax.xlane.f32.xlu1 %v693_v59 }
 0x20a   :  { %697 = vmax.xlane.f32.xlu0 %v696_v4 }
 0x20c   :  { %700 = vmax.xlane.f32.xlu1 %v699_v24 }
 0x27b   :  { %v2194_v37 = vpop.xlane.xlu0 %661 }
 0x27c   :  { %vm850_vm0 = vcmp.eq.f32.partialorder %v2128_v52, %v2194_v37 }
 0x27d   :  { %v866_v63 = vsel %vm850_vm0, %v2192_v6, 64  ;;  %v2199_v21 = vpop.xlane.xlu1 %664 }
 0x27e   :  { %vm851_vm1 = vcmp.eq.f32.partialorder %v2134_v56, %v2199_v21  ;;  %v2204_v17 = vsel %vm653_vm15, %v866_v63, 2147483647  ;;  %v705_v30 = vsub.f32 %v2134_v56, %v2199_v21 }
 0x27f   :  { %v867_v36 = vsel %vm851_vm1, %v2192_v6, 64  ;;  %v2207_v38 = vpop.xlane.xlu0 %685  ;;  %v912_v55 = vshra.s32 %v2204_v17, 16 }
 0x280   :  { %vm858_vm2 = vcmp.eq.f32.partialorder %v2136_v5, %v2207_v38  ;;  %v2218_v40 = vsel %vm653_vm15, %v867_v36, 2147483647 }
 0x281   :  { %v874_v41 = vsel %vm858_vm2, %v2192_v6, 64  ;;  %v2213_v14 = vpop.xlane.xlu1 %688  ;;  %v2215_v12 = vcvt.s32.f32 %v912_v55  ;;  %v927_v45 = vshra.s32 %v2218_v40, 16 }
 0x282   :  { %vm859_vm3 = vcmp.eq.f32.partialorder %v2146_v1, %v2213_v14  ;;  %v2226_v54 = vsel %vm653_vm15, %v874_v41, 2147483647 }
 0x283   :  { %v875_v16 = vsel %vm859_vm3, %v2192_v6, 64  ;;  %915 = vmin.xlane.f32.xlu0 %v2215_v12  ;;  %v656_v0 = vpop.xlane.xlu0 %655  ;;  %v2232_v44 = vcvt.s32.f32 %v927_v45  ;;  %v1032_v8 = vshra.s32 %v2226_v54, 16 }
 0x284   :  { %vm848_vm4 = vcmp.eq.f32.partialorder %v2130_v51, %v656_v0  ;;  %v2236_v62 = vsel %vm653_vm15, %v875_v16, 2147483647  ;;  %v702_v42 = vsub.f32 %v2130_v51, %v656_v0  ;;  %v704_v16 = vsub.f32 %v2128_v52, %v2194_v37 }
 0x285   :  { %v864_v47 = vsel %vm848_vm4, %v2192_v6, 64  ;;  %v2230_v23 = vpop.xlane.xlu1 %658  ;;  %930 = vmin.xlane.f32.xlu1 %v2232_v44  ;;  %v2242_v19 = vcvt.s32.f32 %v1032_v8  ;;  %v1047_v9 = vshra.s32 %v2236_v62, 16  ;;  %v713_v52 = vsub.f32 %v2146_v1, %v2213_v14 }
 0x286   :  { %vm849_vm7 = vcmp.eq.f32.partialorder %v2138_v61, %v2230_v23  ;;  %v2248_v48 = vsel %vm653_vm15, %v864_v47, 2147483647  ;;  %v718_v56 = vmul.f32 1.442695, %v702_v42 }
 0x287   :  { %v865_v49 = vsel %vm849_vm7, %v2192_v6, 64  ;;  %v2244_v7 = vpop.xlane.xlu0 %679  ;;  %1035 = vmin.xlane.f32.xlu0 %v2242_v19  ;;  %v2256_v43 = vcvt.s32.f32 %v1047_v9  ;;  %v882_v29 = vshra.s32 %v2248_v48, 16 }
 0x288   :  { %vm856_vm6 = vcmp.eq.f32.partialorder %v2142_v2, %v2244_v7  ;;  %v2260_v10 = vsel %vm653_vm15, %v865_v49, 2147483647  ;;  %v724_v49 = vmul.f32 1.442695, %v705_v30  ;;  %1340 = vpow2.f32 %v718_v56 }
 0x289   :  { %v872_v20 = vsel %vm856_vm6, %v2192_v6, 64  ;;  %v2254_v53 = vpop.xlane.xlu1 %682  ;;  %1050 = vmin.xlane.f32.xlu1 %v2256_v43  ;;  %v2266_v50 = vcvt.s32.f32 %v882_v29  ;;  %v897_v22 = vshra.s32 %v2260_v10, 16  ;;  %v710_v1 = vsub.f32 %v2142_v2, %v2244_v7 }
 0x28a   :  { %vm857_vm8 = vcmp.eq.f32.partialorder %v2148_v31, %v2254_v53  ;;  %v2272_v34 = vsel %vm653_vm15, %v872_v20, 2147483647  ;;  %1342 = vpow2.f32 %v724_v49  ;;  %v703_v2 = vsub.f32 %v2138_v61, %v2230_v23 }
 0x28b   :  { %v873_v57 = vsel %vm857_vm8, %v2192_v6, 64  ;;  %v2268_v13 = vpop.xlane.xlu0 %673  ;;  %885 = vmin.xlane.f32.xlu0 %v2266_v50  ;;  %v2280_v39 = vcvt.s32.f32 %v897_v22  ;;  %v1002_v32 = vshra.s32 %v2272_v34, 16  ;;  %v722_v22 = vmul.f32 1.442695, %v704_v16 }
 0x28c   :  { %vm854_vm9 = vcmp.eq.f32.partialorder %v2152_v28, %v2268_v13  ;;  %v2284_v3 = vsel %vm653_vm15, %v873_v57, 2147483647  ;;  %v712_v56 = vsub.f32 %v2136_v5, %v2207_v38  ;;  %v720_v5 = vmul.f32 1.442695, %v703_v2 }
 0x28d   :  { %v870_v25 = vsel %vm854_vm9, %v2192_v6, 64  ;;  %v2278_v46 = vpop.xlane.xlu1 %676  ;;  %900 = vmin.xlane.f32.xlu1 %v2280_v39  ;;  %v2291_v27 = vcvt.s32.f32 %v1002_v32  ;;  %v1017_v4 = vshra.s32 %v2284_v3, 16  ;;  %1344 = vpow2.f32 %v722_v22 }
 0x28e   :  { %vm855_vm5 = vcmp.eq.f32.partialorder %v2158_v58, %v2278_v46  ;;  %v2297_v24 = vsel %vm653_vm15, %v870_v25, 2147483647  ;;  %v711_v38 = vsub.f32 %v2148_v31, %v2254_v53  ;;  %v709_v53 = vsub.f32 %v2158_v58, %v2278_v46 }
 0x28f   :  { %v871_v18 = vsel %vm855_vm5, %v2192_v6, 64  ;;  %v2293_v59 = vpop.xlane.xlu0 %667  ;;  %1005 = vmin.xlane.f32.xlu0 %v2291_v27  ;;  %v2307_v36 = vcvt.s32.f32 %v1017_v4  ;;  %v972_v55 = vshra.s32 %v2297_v24, 16  ;;  %v740_v4 = vmul.f32 1.442695, %v713_v52 }
 0x290   :  { %vm852_vm10 = vcmp.eq.f32.partialorder %v2156_v35, %v2293_v59  ;;  %v2311_v41 = vsel %vm653_vm15, %v871_v18, 2147483647  ;;  %v736_v31 = vmul.f32 1.442695, %v711_v38 }
 0x291   :  { %v868_v51 = vsel %vm852_vm10, %v2192_v6, 64  ;;  %v2305_v63 = vpop.xlane.xlu1 %670  ;;  %1020 = vmin.xlane.f32.xlu1 %v2307_v36  ;;  %v2319_v0 = vcvt.s32.f32 %v972_v55  ;;  %v987_v47 = vshra.s32 %v2311_v41, 16  ;;  %1346 = vpow2.f32 %v740_v4 }
 0x292   :  { %vm853_vm12 = vcmp.eq.f32.partialorder %v2164_v60, %v2305_v63  ;;  %v2325_v8 = vsel %vm653_vm15, %v868_v51, 2147483647  ;;  %v2392_v4 = vpop.eup %1340 }
 0x293   :  { %v869_v21 = vsel %vm853_vm12, %v2192_v6, 64  ;;  %v2321_v45 = vpop.xlane.xlu0 %691  ;;  %975 = vmin.xlane.f32.xlu0 %v2319_v0  ;;  %v2333_v9 = vcvt.s32.f32 %v987_v47  ;;  %v942_v29 = vshra.s32 %v2325_v8, 16 }
 0x294   :  { %vm860_vm11 = vcmp.eq.f32.partialorder %v2166_v26, %v2321_v45  ;;  %v2339_v57 = vsel %vm653_vm15, %v869_v21, 2147483647  ;;  %v734_v21 = vmul.f32 1.442695, %v710_v1  ;;  %v738_v1 = vmul.f32 1.442695, %v712_v56  ;;  %v2397_v2 = vpop.eup %1342 }
 0x295   :  { %v876_v37 = vsel %vm860_vm11, %v2192_v6, 64  ;;  %v2335_v20 = vpop.xlane.xlu1 %694  ;;  %990 = vmin.xlane.f32.xlu1 %v2333_v9  ;;  %v2347_v25 = vcvt.s32.f32 %v942_v29  ;;  %v957_v42 = vshra.s32 %v2339_v57, 16  ;;  %v732_v56 = vmul.f32 1.442695, %v709_v53 }
 0x296   :  { %vm861_vm13 = vcmp.eq.f32.partialorder %v2172_v33, %v2335_v20  ;;  %v2351_v18 = vsel %vm653_vm15, %v876_v37, 2147483647  ;;  %1348 = vpow2.f32 %v734_v21  ;;  %v759_v46 = vsel %vm653_vm15, %v2397_v2, 0.0 }
 0x297   :  { %v877_v14 = vsel %vm861_vm13, %v2192_v6, 64  ;;  %v698_v32 = vpop.xlane.xlu0 %697  ;;  %945 = vmin.xlane.f32.xlu0 %v2347_v25  ;;  %v2358_v30 = vcvt.s32.f32 %v957_v42  ;;  %v1062_v55 = vshra.s32 %v2351_v18, 16  ;;  %1350 = vpow2.f32 %v720_v5 }
 0x298   :  { %vm862_vm14 = vcmp.eq.f32.partialorder %v2160_v11, %v698_v32  ;;  %v2362_v16 = vsel %vm653_vm15, %v877_v14, 2147483647  ;;  %v708_v14 = vsub.f32 %v2152_v28, %v2268_v13  ;;  %1352 = vpow2.f32 %v738_v1  ;;  %v2401_v28 = vpop.eup %1344 }
 0x299   :  { %v878_v7 = vsel %vm862_vm14, %v2192_v6, 64  ;;  %v701_v51 = vpop.xlane.xlu1 %700  ;;  %960 = vmin.xlane.f32.xlu1 %v2358_v30  ;;  %v2369_v23 = vcvt.s32.f32 %v1062_v55  ;;  %v1077_v47 = vshra.s32 %v2362_v16, 16  ;;  %v716_v55 = vsub.f32 %v2160_v11, %v698_v32 }
 0x29a   :  { %vm863_vm0 = vcmp.eq.f32.partialorder %v2168_v15, %v701_v51  ;;  %v2373_v49 = vsel %vm653_vm15, %v878_v7, 2147483647  ;;  %v730_v7 = vmul.f32 1.442695, %v708_v14  ;;  %v750_v13 = vsel %vm653_vm15, %v2392_v4, 0.0 }
 0x29b   :  { %v879_v61 = vsel %vm863_vm0, %v2192_v6, 64  ;;  %v1092_v52 = vshra.s32 %v2373_v49, 16  ;;  %1065 = vmin.xlane.f32.xlu0 %v2369_v23  ;;  %v2382_v6 = vcvt.s32.f32 %v1077_v47  ;;  %1354 = vpow2.f32 %v736_v31  ;;  %v2406_v58 = vpop.eup %1346 }
 0x29c   :  { %v2377_v37 = vsel %vm653_vm15, %v879_v61, 2147483647  ;;  %v717_v21 = vsub.f32 %v2168_v15, %v701_v51  ;;  %1356 = vpow2.f32 %v730_v7  ;;  %v706_v11 = vsub.f32 %v2156_v35, %v2293_v59 }
 0x29d   :  { %v1107_v29 = vshra.s32 %v2377_v37, 16  ;;  %v2385_v22 = vcvt.s32.f32 %v1092_v52  ;;  %1080 = vmin.xlane.f32.xlu1 %v2382_v6  ;;  %v746_v32 = vmul.f32 1.442695, %v716_v55  ;;  %v756_v61 = vsel %vm653_vm15, %v2401_v28, 0.0 }
 0x29e   :  { %1358 = vpow2.f32 %v732_v56  ;;  %v707_v15 = vsub.f32 %v2164_v60, %v2305_v63  ;;  %v748_v51 = vmul.f32 1.442695, %v717_v21  ;;  %v783_v52 = vsel %vm653_vm15, %v2406_v58, 0.0 }
 0x29f   :  { %v2390_v42 = vcvt.s32.f32 %v1107_v29  ;;  %1095 = vmin.xlane.f32.xlu0 %v2385_v22  ;;  %v726_v38 = vmul.f32 1.442695, %v706_v11  ;;  %v714_v35 = vsub.f32 %v2166_v26, %v2321_v45  ;;  %1360 = vpow2.f32 %v746_v32 }
 0x2a0   :  { %v2414_v47 = vpop.eup %1348  ;;  %v728_v1 = vmul.f32 1.442695, %v707_v15  ;;  %v715_v60 = vsub.f32 %v2172_v33, %v2335_v20  ;;  %1362 = vpow2.f32 %v748_v51 }
 0x2a1   :  { %1110 = vmin.xlane.f32.xlu1 %v2390_v42  ;;  %v2420_v5 = vpop.eup %1350  ;;  %v774_v59 = vsel %vm653_vm15, %v2414_v47, 0.0  ;;  %1364 = vpow2.f32 %v726_v38  ;;  %v742_v26 = vmul.f32 1.442695, %v714_v35 }
 0x2a2   :  { %v2426_v29 = vpop.eup %1352  ;;  %v753_v63 = vsel %vm653_vm15, %v2420_v5, 0.0  ;;  %1366 = vpow2.f32 %v728_v1  ;;  %v744_v53 = vmul.f32 1.442695, %v715_v60 }
 0x2a3   :  { %751 = vadd.xlane.f32.xlu0 %v750_v13  ;;  %v780_v45 = vsel %vm653_vm15, %v2426_v29, 0.0  ;;  %1368 = vpow2.f32 %v742_v26 }
 0x2a4   :  { %1370 = vpow2.f32 %v744_v53 }
 0x2a5   :  { %760 = vadd.xlane.f32.xlu1 %v759_v46  ;;  %v2432_v14 = vpop.eup %1354 }
 0x2a6   :  { %v2436_v31 = vpop.eup %1356  ;;  %v777_v33 = vsel %vm653_vm15, %v2432_v14, 0.0 }
 0x2a7   :  { %757 = vadd.xlane.f32.xlu0 %v756_v61  ;;  %v768_v7 = vsel %vm653_vm15, %v2436_v31, 0.0 }
 0x2a8   :  { %v2440_v20 = vpop.eup %1358 }
 0x2a9   :  { %784 = vadd.xlane.f32.xlu1 %v783_v52  ;;  %v2444_v55 = vpop.eup %1360  ;;  %v771_v13 = vsel %vm653_vm15, %v2440_v20, 0.0 }
 0x2aa   :  { %v2448_v56 = vpop.eup %1362  ;;  %v792_v21 = vsel %vm653_vm15, %v2444_v55, 0.0 }
 0x2ab   :  { %775 = vadd.xlane.f32.xlu0 %v774_v59  ;;  %v2452_v46 = vpop.eup %1364  ;;  %v795_v11 = vsel %vm653_vm15, %v2448_v56, 0.0  ;;  %v911_v59 = vand.u32 65535, %v2204_v17 }
 0x2ac   :  { %v2456_v32 = vpop.eup %1366  ;;  %v762_v61 = vsel %vm653_vm15, %v2452_v46, 0.0 }
 0x2ad   :  { %754 = vadd.xlane.f32.xlu1 %v753_v63  ;;  %v2460_v15 = vpop.eup %1368  ;;  %v765_v51 = vsel %vm653_vm15, %v2456_v32, 0.0  ;;  %v913_v60 = vcvt.s32.f32 %v911_v59  ;;  %v926_v63 = vand.u32 65535, %v2218_v40  ;;  %v881_v40 = vand.u32 65535, %v2248_v48 }
 0x2ae   :  { %v2464_v52 = vpop.eup %1370  ;;  %v786_v38 = vsel %vm653_vm15, %v2460_v15, 0.0  ;;  %v1001_v48 = vand.u32 65535, %v2272_v34  ;;  %v971_v34 = vand.u32 65535, %v2297_v24  ;;  %v941_v24 = vand.u32 65535, %v2325_v8 }
 0x2af   :  { %781 = vadd.xlane.f32.xlu0 %v780_v45  ;;  %v789_v35 = vsel %vm653_vm15, %v2464_v52, 0.0  ;;  %v1031_v45 = vand.u32 65535, %v2226_v54  ;;  %v1061_v8 = vand.u32 65535, %v2351_v18  ;;  %v1091_v18 = vand.u32 65535, %v2373_v49 }
 0x2b1   :  { %778 = vadd.xlane.f32.xlu1 %v777_v33  ;;  %v928_v33 = vcvt.s32.f32 %v926_v63 }
 0x2b3   :  { %769 = vadd.xlane.f32.xlu0 %v768_v7  ;;  %v1046_v7 = vand.u32 65535, %v2236_v62 }
 0x2b5   :  { %772 = vadd.xlane.f32.xlu1 %v771_v13 }
 0x2b7   :  { %793 = vadd.xlane.f32.xlu0 %v792_v21  ;;  %v1033_v21 = vcvt.s32.f32 %v1031_v45 }
 0x2b9   :  { %796 = vadd.xlane.f32.xlu1 %v795_v11  ;;  %v1048_v11 = vcvt.s32.f32 %v1046_v7 }
 0x2bb   :  { %763 = vadd.xlane.f32.xlu0 %v762_v61  ;;  %v896_v61 = vand.u32 65535, %v2260_v10  ;;  %v1016_v10 = vand.u32 65535, %v2284_v3  ;;  %v986_v3 = vand.u32 65535, %v2311_v41  ;;  %v956_v41 = vand.u32 65535, %v2339_v57 }
 0x2bc   :  { %v1076_v57 = vand.u32 65535, %v2362_v16  ;;  %v1106_v16 = vand.u32 65535, %v2377_v37 }
 0x2bd   :  { %766 = vadd.xlane.f32.xlu1 %v765_v51  ;;  %v883_v51 = vcvt.s32.f32 %v881_v40  ;;  %v943_v40 = vcvt.s32.f32 %v941_v24 }
 0x2bf   :  { %787 = vadd.xlane.f32.xlu0 %v786_v38 }
 0x2c1   :  { %790 = vadd.xlane.f32.xlu1 %v789_v35  ;;  %v898_v35 = vcvt.s32.f32 %v896_v61 }
 0x310   :  { %v2471_v1 = vpop.xlane.xlu0 %915 }
 0x311   :  { %vm917_vm1 = vcmp.eq.f32.partialorder %v2215_v12, %v2471_v1 }
 0x312   :  { %v918_v26 = vsel %vm917_vm1, %v913_v60, inf  ;;  %v2477_v53 = vpop.xlane.xlu1 %930  ;;  %v1003_v60 = vcvt.s32.f32 %v1001_v48  ;;  %v1078_v48 = vcvt.s32.f32 %v1076_v57 }
 0x313   :  { %919 = vmin.xlane.f32.xlu0 %v918_v26  ;;  %vm932_vm2 = vcmp.eq.f32.partialorder %v2232_v44, %v2477_v53  ;;  %v1018_v26 = vcvt.s32.f32 %v1016_v10  ;;  %v1108_v10 = vcvt.s32.f32 %v1106_v16 }
 0x314   :  { %v2482_v17 = vpop.xlane.xlu0 %1035  ;;  %v933_v13 = vsel %vm932_vm2, %v928_v33, inf  ;;  %v973_v33 = vcvt.s32.f32 %v971_v34 }
 0x315   :  { %934 = vmin.xlane.f32.xlu1 %v933_v13  ;;  %vm1037_vm3 = vcmp.eq.f32.partialorder %v2242_v19, %v2482_v17  ;;  %v988_v13 = vcvt.s32.f32 %v986_v3 }
 0x316   :  { %v2487_v12 = vpop.xlane.xlu1 %1050  ;;  %v1038_v54 = vsel %vm1037_vm3, %v1033_v21, inf }
 0x317   :  { %1039 = vmin.xlane.f32.xlu0 %v1038_v54  ;;  %vm1052_vm4 = vcmp.eq.f32.partialorder %v2256_v43, %v2487_v12 }
 0x318   :  { %v2492_v44 = vpop.xlane.xlu0 %885  ;;  %v1053_v62 = vsel %vm1052_vm4, %v1048_v11, inf  ;;  %v958_v11 = vcvt.s32.f32 %v956_v41 }
 0x319   :  { %1054 = vmin.xlane.f32.xlu1 %v1053_v62  ;;  %vm887_vm7 = vcmp.eq.f32.partialorder %v2266_v50, %v2492_v44  ;;  %v1063_v62 = vcvt.s32.f32 %v1061_v8 }
 0x31a   :  { %v2497_v19 = vpop.xlane.xlu1 %900  ;;  %v888_v38 = vsel %vm887_vm7, %v883_v51, inf }
 0x31b   :  { %889 = vmin.xlane.f32.xlu0 %v888_v38  ;;  %vm902_vm6 = vcmp.eq.f32.partialorder %v2280_v39, %v2497_v19 }
 0x31c   :  { %v2502_v43 = vpop.xlane.xlu0 %1005  ;;  %v903_v59 = vsel %vm902_vm6, %v898_v35, inf  ;;  %v1093_v35 = vcvt.s32.f32 %v1091_v18 }
 0x31d   :  { %904 = vmin.xlane.f32.xlu1 %v903_v59  ;;  %vm1007_vm8 = vcmp.eq.f32.partialorder %v2291_v27, %v2502_v43 }
 0x31e   :  { %v2507_v50 = vpop.xlane.xlu1 %1020  ;;  %v1008_v63 = vsel %vm1007_vm8, %v1003_v60, inf }
 0x31f   :  { %1009 = vmin.xlane.f32.xlu0 %v1008_v63  ;;  %vm1022_vm9 = vcmp.eq.f32.partialorder %v2307_v36, %v2507_v50 }
 0x320   :  { %v2512_v39 = vpop.xlane.xlu0 %975  ;;  %v1023_v45 = vsel %vm1022_vm9, %v1018_v26, inf }
 0x321   :  { %1024 = vmin.xlane.f32.xlu1 %v1023_v45  ;;  %vm977_vm5 = vcmp.eq.f32.partialorder %v2319_v0, %v2512_v39 }
 0x322   :  { %v2517_v27 = vpop.xlane.xlu1 %990  ;;  %v978_v7 = vsel %vm977_vm5, %v973_v33, inf }
 0x323   :  { %979 = vmin.xlane.f32.xlu0 %v978_v7  ;;  %vm992_vm10 = vcmp.eq.f32.partialorder %v2333_v9, %v2517_v27 }
 0x324   :  { %v2522_v36 = vpop.xlane.xlu0 %945  ;;  %v993_v21 = vsel %vm992_vm10, %v988_v13, inf }
 0x325   :  { %994 = vmin.xlane.f32.xlu1 %v993_v21  ;;  %vm947_vm12 = vcmp.eq.f32.partialorder %v2347_v25, %v2522_v36 }
 0x326   :  { %v2527_v0 = vpop.xlane.xlu1 %960  ;;  %v948_v54 = vsel %vm947_vm12, %v943_v40, inf }
 0x327   :  { %949 = vmin.xlane.f32.xlu0 %v948_v54  ;;  %vm962_vm11 = vcmp.eq.f32.partialorder %v2358_v30, %v2527_v0 }
 0x328   :  { %v2532_v9 = vpop.xlane.xlu0 %1065  ;;  %v963_v61 = vsel %vm962_vm11, %v958_v11, inf }
 0x329   :  { %964 = vmin.xlane.f32.xlu1 %v963_v61  ;;  %vm1067_vm13 = vcmp.eq.f32.partialorder %v2369_v23, %v2532_v9 }
 0x32a   :  { %v2537_v25 = vpop.xlane.xlu1 %1080  ;;  %v1068_v51 = vsel %vm1067_vm13, %v1063_v62, inf }
 0x32b   :  { %1069 = vmin.xlane.f32.xlu0 %v1068_v51  ;;  %vm1082_vm14 = vcmp.eq.f32.partialorder %v2382_v6, %v2537_v25 }
 0x32c   :  { %v2542_v30 = vpop.xlane.xlu0 %1095  ;;  %v1083_v38 = vsel %vm1082_vm14, %v1078_v48, inf }
 0x32d   :  { %1084 = vmin.xlane.f32.xlu1 %v1083_v38  ;;  %vm1097_vm0 = vcmp.eq.f32.partialorder %v2385_v22, %v2542_v30 }
 0x32e   :  { %v2546_v49 = vpop.xlane.xlu1 %1110  ;;  %v1098_v23 = vsel %vm1097_vm0, %v1093_v35, inf }
 0x32f   :  { %1099 = vmin.xlane.f32.xlu0 %v1098_v23  ;;  %vm1112_vm1 = vcmp.eq.f32.partialorder %v2390_v42, %v2546_v49 }
 0x330   :  { %v752_v37 = vpop.xlane.xlu0 %751  ;;  %v1113_v59 = vsel %vm1112_vm1, %v1108_v10, inf }
 0x331   :  { %1372 = vrcp.f32 %v752_v37  ;;  %1114 = vmin.xlane.f32.xlu1 %v1113_v59 }
 0x332   :  { %v761_v6 = vpop.xlane.xlu1 %760 }
 0x333   :  { %1374 = vrcp.f32 %v761_v6 }
 0x334   :  { %v758_v60 = vpop.xlane.xlu0 %757 }
 0x335   :  { %1376 = vrcp.f32 %v758_v60 }
 0x336   :  { %v785_v34 = vpop.xlane.xlu1 %784 }
 0x337   :  { %1378 = vrcp.f32 %v785_v34 }
 0x338   :  { %v776_v63 = vpop.xlane.xlu0 %775 }
 0x339   :  { %1380 = vrcp.f32 %v776_v63 }
 0x33a   :  { %v755_v22 = vpop.xlane.xlu1 %754 }
 0x33b   :  { %v1373_v26 = vpop.eup %1372  ;;  %1382 = vrcp.f32 %v755_v22 }
 0x33c   :  { %v814_v3 = vmul.f32 %v1373_v26, %v2392_v4  ;;  %v782_v45 = vpop.xlane.xlu0 %781 }
 0x33d   :  { %v1375_v33 = vpop.eup %1374  ;;  %1384 = vrcp.f32 %v782_v45 }
 0x33e   :  { %830 = vst.msk [vmem:[#allocation7] sm:$0xff] %vm653_vm15, %v814_v3  ;;  %v817_v42 = vmul.f32 %v1375_v33, %v2397_v2  ;;  %v779_v24 = vpop.xlane.xlu1 %778 }
 0x33f   :  { %v1377_v7 = vpop.eup %1376  ;;  %1386 = vrcp.f32 %v779_v24 }
 0x340   :  { %833 = vst.msk [vmem:[#allocation7 + $0x18] sm:$0xff] %vm653_vm15, %v817_v42  ;;  %v816_v13 = vmul.f32 %v1377_v7, %v2401_v28  ;;  %v770_v41 = vpop.xlane.xlu0 %769 }
 0x341   :  { %v1379_v21 = vpop.eup %1378  ;;  %1388 = vrcp.f32 %v770_v41 }
 0x342   :  { %832 = vst.msk [vmem:[#allocation7 + $0x10] sm:$0xff] %vm653_vm15, %v816_v13  ;;  %v825_v4 = vmul.f32 %v1379_v21, %v2406_v58  ;;  %v773_v40 = vpop.xlane.xlu1 %772 }
 0x343   :  { %v1381_v8 = vpop.eup %1380  ;;  %1390 = vrcp.f32 %v773_v40 }
 0x344   :  { %841 = vst.msk [vmem:[#allocation7 + $0x58] sm:$0xff] %vm653_vm15, %v825_v4  ;;  %v822_v2 = vmul.f32 %v1381_v8, %v2414_v47  ;;  %v794_v54 = vpop.xlane.xlu0 %793 }
 0x345   :  { %v1383_v11 = vpop.eup %1382  ;;  %1392 = vrcp.f32 %v794_v54 }
 0x346   :  { %838 = vst.msk [vmem:[#allocation7 + $0x40] sm:$0xff] %vm653_vm15, %v822_v2  ;;  %v815_v28 = vmul.f32 %v1383_v11, %v2420_v5  ;;  %v797_v57 = vpop.xlane.xlu1 %796 }
 0x347   :  { %v1385_v61 = vpop.eup %1384  ;;  %1394 = vrcp.f32 %v797_v57 }
 0x348   :  { %831 = vst.msk [vmem:[#allocation7 + $0x8] sm:$0xff] %vm653_vm15, %v815_v28  ;;  %v824_v58 = vmul.f32 %v1385_v61, %v2426_v29  ;;  %v764_v62 = vpop.xlane.xlu0 %763 }
 0x349   :  { %v1387_v18 = vpop.eup %1386  ;;  %1396 = vrcp.f32 %v764_v62 }
 0x34a   :  { %840 = vst.msk [vmem:[#allocation7 + $0x50] sm:$0xff] %vm653_vm15, %v824_v58  ;;  %v823_v47 = vmul.f32 %v1387_v18, %v2432_v14  ;;  %v767_v51 = vpop.xlane.xlu1 %766 }
 0x34b   :  { %v1389_v48 = vpop.eup %1388  ;;  %1398 = vrcp.f32 %v767_v51 }
 0x34c   :  { %839 = vst.msk [vmem:[#allocation7 + $0x48] sm:$0xff] %vm653_vm15, %v823_v47  ;;  %v820_v5 = vmul.f32 %v1389_v48, %v2436_v31  ;;  %v788_v16 = vpop.xlane.xlu0 %787 }
 0x34d   :  { %v1391_v38 = vpop.eup %1390  ;;  %1400 = vrcp.f32 %v788_v16 }
 0x34e   :  { %836 = vst.msk [vmem:[#allocation7 + $0x30] sm:$0xff] %vm653_vm15, %v820_v5  ;;  %v821_v29 = vmul.f32 %v1391_v38, %v2440_v20  ;;  %v791_v35 = vpop.xlane.xlu1 %790 }
 0x34f   :  { %v1393_v23 = vpop.eup %1392  ;;  %1402 = vrcp.f32 %v791_v35 }
 0x350   :  { %837 = vst.msk [vmem:[#allocation7 + $0x38] sm:$0xff] %vm653_vm15, %v821_v29  ;;  %v828_v14 = vmul.f32 %v1393_v23, %v2444_v55 }
 0x351   :  { %v1395_v10 = vpop.eup %1394 }
 0x352   :  { %844 = vst.msk [vmem:[#allocation7 + $0x70] sm:$0xff] %vm653_vm15, %v828_v14  ;;  %v829_v37 = vmul.f32 %v1395_v10, %v2448_v56 }
 0x353   :  { %v1397_v31 = vpop.eup %1396 }
 0x354   :  { %845 = vst.msk [vmem:[#allocation7 + $0x78] sm:$0xff] %vm653_vm15, %v829_v37  ;;  %v818_v59 = vmul.f32 %v1397_v31, %v2452_v46 }
 0x355   :  { %v1399_v6 = vpop.eup %1398 }
 0x356   :  { %834 = vst.msk [vmem:[#allocation7 + $0x20] sm:$0xff] %vm653_vm15, %v818_v59  ;;  %v819_v20 = vmul.f32 %v1399_v6, %v2456_v32 }
 0x357   :  { %v1401_v60 = vpop.eup %1400 }
 0x358   :  { %835 = vst.msk [vmem:[#allocation7 + $0x28] sm:$0xff] %vm653_vm15, %v819_v20  ;;  %v826_v55 = vmul.f32 %v1401_v60, %v2460_v15 }
 0x359   :  { %v1403_v34 = vpop.eup %1402 }
 0x35a   :  { %842 = vst.msk [vmem:[#allocation7 + $0x60] sm:$0xff] %vm653_vm15, %v826_v55  ;;  %v827_v56 = vmul.f32 %v1403_v34, %v2464_v52 }
 0x35c   :  { %843 = vst.msk [vmem:[#allocation7 + $0x68] sm:$0xff] %vm653_vm15, %v827_v56 }
 0x35d   :  { %1459 = shalt.err (!%p1456_p6)
}
 0x35e   :  { %s1460_s14 = scalar_lea.hbm %s2679_s2, 2048 }
 0x35f   :  { %p1461_p7 = scmp.ne.s32.totalorder %s2679_s2, %s1460_s14  ;;  %p1464_p8 = scmp.lt.u32.totalorder %s1460_s14, %s2679_s2 }
 0x361   :  { %p1466_p9 = pnand %p1464_p8, %p1461_p7 }
 0x363   :  { %1469 = shalt.err (!%p1466_p9)
}
 0x364   :  { %1148 = dma.vmem_to_hbm [thread:$0]  %s1143_s10, 2048, %s2679_s2, [#allocation4], %s1477_s22, %s1477_s22, %s1478_s23   ;;  %v922_v46 = vcvt.f32.s32 %v2471_v1  ;;  %v937_v52 = vcvt.f32.s32 %v2477_v53  ;;  %vm1120_vm15 = vcmask 7168   ;;  %v1042_v22 = vcvt.f32.s32 %v2482_v17 }
 0x365   :  { %v1057_v33 = vcvt.f32.s32 %v2487_v12  ;;  %v892_v7 = vcvt.f32.s32 %v2492_v44  ;;  %v907_v17 = vcvt.f32.s32 %v2497_v19  ;;  %v1012_v2 = vcvt.f32.s32 %v2502_v43 }
 0x366   :  { %v923_v15 = vshll.u32 %v922_v46, 16  ;;  %v938_v45 = vshll.u32 %v937_v52, 16  ;;  %v1043_v24 = vshll.u32 %v1042_v22, 16  ;;  %v1027_v28 = vcvt.f32.s32 %v2507_v50 }
 0x367   :  { %v1058_v21 = vshll.u32 %v1057_v33, 16  ;;  %v893_v8 = vshll.u32 %v892_v7, 16  ;;  %v908_v19 = vshll.u32 %v907_v17, 16  ;;  %v1013_v43 = vshll.u32 %v1012_v2, 16 }
 0x368   :  { %v982_v62 = vcvt.f32.s32 %v2512_v39  ;;  %v1028_v50 = vshll.u32 %v1027_v28, 16  ;;  %v997_v48 = vcvt.f32.s32 %v2517_v27  ;;  %v952_v29 = vcvt.f32.s32 %v2522_v36 }
 0x369   :  { %v967_v10 = vcvt.f32.s32 %v2527_v0  ;;  %v1072_v6 = vcvt.f32.s32 %v2532_v9  ;;  %v1087_v34 = vcvt.f32.s32 %v2537_v25 }
 0x36a   :  { %v983_v39 = vshll.u32 %v982_v62, 16  ;;  %v998_v27 = vshll.u32 %v997_v48, 16  ;;  %v953_v36 = vshll.u32 %v952_v29, 16 }
 0x36b   :  { %v968_v0 = vshll.u32 %v967_v10, 16  ;;  %v1073_v9 = vshll.u32 %v1072_v6, 16  ;;  %v1088_v25 = vshll.u32 %v1087_v34, 16 }
 0x3a0   :  { %v920_v32 = vpop.xlane.xlu0 %919 }
 0x3a1   :  { %v921_v63 = vcvt.f32.s32 %v920_v32 }
 0x3a2   :  { %v935_v3 = vpop.xlane.xlu1 %934 }
 0x3a3   :  { %v924_v26 = vadd.s32 %v923_v15, %v921_v63  ;;  %v936_v42 = vcvt.f32.s32 %v935_v3  ;;  %v1102_v15 = vcvt.f32.s32 %v2542_v30 }
 0x3a4   :  { %v1040_v1 = vpop.xlane.xlu0 %1039 }
 0x3a5   :  { %1123 = vst.msk [vmem:[%s2680_s3 + $0x10] sm:$0xff] %vm1120_vm15, %v924_v26  ;;  %v939_v53 = vadd.s32 %v938_v45, %v936_v42  ;;  %v1041_v13 = vcvt.f32.s32 %v1040_v1  ;;  %v1117_v26 = vcvt.f32.s32 %v2546_v49  ;;  %v1103_v30 = vshll.u32 %v1102_v15, 16 }
 0x3a6   :  { %v1055_v41 = vpop.xlane.xlu1 %1054 }
 0x3a7   :  { %1124 = vst.msk [vmem:[%s2680_s3 + $0x18] sm:$0xff] %vm1120_vm15, %v939_v53  ;;  %v1044_v12 = vadd.s32 %v1043_v24, %v1041_v13  ;;  %v1056_v4 = vcvt.f32.s32 %v1055_v41  ;;  %v1118_v7 = vshll.u32 %v1117_v26, 16 }
 0x3a8   :  { %v890_v40 = vpop.xlane.xlu0 %889 }
 0x3a9   :  { %1131 = vst.msk [vmem:[%s2680_s3 + $0x50] sm:$0xff] %vm1120_vm15, %v1044_v12  ;;  %v1059_v44 = vadd.s32 %v1058_v21, %v1056_v4  ;;  %v891_v54 = vcvt.f32.s32 %v890_v40 }
 0x3aa   :  { %v905_v11 = vpop.xlane.xlu1 %904 }
 0x3ab   :  { %1132 = vst.msk [vmem:[%s2680_s3 + $0x58] sm:$0xff] %vm1120_vm15, %v1059_v44  ;;  %v894_v57 = vadd.s32 %v893_v8, %v891_v54  ;;  %v906_v61 = vcvt.f32.s32 %v905_v11 }
 0x3ac   :  { %v1010_v58 = vpop.xlane.xlu0 %1009 }
 0x3ad   :  { %1121 = vst.msk [vmem:[%s2680_s3] sm:$0xff] %vm1120_vm15, %v894_v57  ;;  %v909_v18 = vadd.s32 %v908_v19, %v906_v61  ;;  %v1011_v47 = vcvt.f32.s32 %v1010_v58 }
 0x3ae   :  { %v1025_v51 = vpop.xlane.xlu1 %1024 }
 0x3af   :  { %1122 = vst.msk [vmem:[%s2680_s3 + $0x8] sm:$0xff] %vm1120_vm15, %v909_v18  ;;  %v1014_v5 = vadd.s32 %v1013_v43, %v1011_v47  ;;  %v1026_v16 = vcvt.f32.s32 %v1025_v51 }
 0x3b0   :  { %v980_v38 = vpop.xlane.xlu0 %979 }
 0x3b1   :  { %1129 = vst.msk [vmem:[%s2680_s3 + $0x40] sm:$0xff] %vm1120_vm15, %v1014_v5  ;;  %v1029_v35 = vadd.s32 %v1028_v50, %v1026_v16  ;;  %v981_v23 = vcvt.f32.s32 %v980_v38 }
 0x3b2   :  { %v995_v14 = vpop.xlane.xlu1 %994 }
 0x3b3   :  { %1130 = vst.msk [vmem:[%s2680_s3 + $0x48] sm:$0xff] %vm1120_vm15, %v1029_v35  ;;  %v984_v37 = vadd.s32 %v983_v39, %v981_v23  ;;  %v996_v31 = vcvt.f32.s32 %v995_v14 }
 0x3b4   :  { %v950_v59 = vpop.xlane.xlu0 %949 }
 0x3b5   :  { %1127 = vst.msk [vmem:[%s2680_s3 + $0x30] sm:$0xff] %vm1120_vm15, %v984_v37  ;;  %v999_v20 = vadd.s32 %v998_v27, %v996_v31  ;;  %v951_v60 = vcvt.f32.s32 %v950_v59 }
 0x3b6   :  { %v965_v55 = vpop.xlane.xlu1 %964 }
 0x3b7   :  { %1128 = vst.msk [vmem:[%s2680_s3 + $0x38] sm:$0xff] %vm1120_vm15, %v999_v20  ;;  %v954_v56 = vadd.s32 %v953_v36, %v951_v60  ;;  %v966_v46 = vcvt.f32.s32 %v965_v55 }
 0x3b8   :  { %v1070_v32 = vpop.xlane.xlu0 %1069 }
 0x3b9   :  { %1125 = vst.msk [vmem:[%s2680_s3 + $0x20] sm:$0xff] %vm1120_vm15, %v954_v56  ;;  %v969_v52 = vadd.s32 %v968_v0, %v966_v46  ;;  %v1071_v63 = vcvt.f32.s32 %v1070_v32 }
 0x3ba   :  { %v1085_v22 = vpop.xlane.xlu1 %1084 }
 0x3bb   :  { %1126 = vst.msk [vmem:[%s2680_s3 + $0x28] sm:$0xff] %vm1120_vm15, %v969_v52  ;;  %v1074_v3 = vadd.s32 %v1073_v9, %v1071_v63  ;;  %v1086_v45 = vcvt.f32.s32 %v1085_v22 }
 0x3bc   :  { %v1100_v33 = vpop.xlane.xlu0 %1099 }
 0x3bd   :  { %1133 = vst.msk [vmem:[%s2680_s3 + $0x60] sm:$0xff] %vm1120_vm15, %v1074_v3  ;;  %v1089_v42 = vadd.s32 %v1088_v25, %v1086_v45  ;;  %v1101_v1 = vcvt.f32.s32 %v1100_v33 }
 0x3be   :  { %v1115_v24 = vpop.xlane.xlu1 %1114 }
 0x3bf   :  { %1134 = vst.msk [vmem:[%s2680_s3 + $0x68] sm:$0xff] %vm1120_vm15, %v1089_v42  ;;  %v1104_v49 = vadd.s32 %v1103_v30, %v1101_v1  ;;  %v1116_v53 = vcvt.f32.s32 %v1115_v24 }
 0x3c1   :  { %1135 = vst.msk [vmem:[%s2680_s3 + $0x70] sm:$0xff] %vm1120_vm15, %v1104_v49  ;;  %v1119_v13 = vadd.s32 %v1118_v7, %v1116_v53 }
 0x3c3   :  { %1136 = vst.msk [vmem:[%s2680_s3 + $0x78] sm:$0xff] %vm1120_vm15, %v1119_v13 }
 0x3c4   :  { %1474 = dma.done.wait [#allocation4], 2048  }
 0x3c5   :  { %1475 = vsyncadd [#allocation4], 4294965248 }
 0x3c6   :  { %1156 = vsyncpa [#allocation3], 1 }
 0x3c7   :  { %1157 = vsyncpa [#allocation6], 1 }
 0x3c8   :  { %1158 = vsyncpa [#allocation4], 1 }

</bundles_post_ra>
